<compile_context>
chip_gen: v7x
topology: tpu7x:2x2x1
jax: 0.10.0
libtpu: 0.0.40
codegen_flags: <defaults>
</compile_context>

<pallas_src>
import functools

import jax
import jax.numpy as jnp
from jax import lax
from jax.experimental import pallas as pl
from jax.experimental.pallas import tpu as pltpu

LANE = 128  # TPU lane width; channel dims are padded to a multiple of this.


def _round_up(x, m):
    return ((x + m - 1) // m) * m


def _apply_act(y, act):
    """f32 activation inside the kernel (static Python branch)."""
    if act == "relu":
        return jnp.maximum(y, 0.0)
    if act in ("silu", "swish"):
        # hand-rolled sigmoid: exp on EUP, safe Mosaic lowering
        return y * (1.0 / (1.0 + jnp.exp(-y)))
    return y


# -----------------------------------------------------------------------------
# Pallas kernel: fused 3x3 conv + bias + act on one (batch, row-tile).
# -----------------------------------------------------------------------------
def _conv3x3_kernel(x_ref, w_ref, b_ref, o_ref, acc_ref, *, act):
    # x_ref  : (1, H+2, Wp, Cip) bf16 zero-padded NHWC image (lane-dense C);
    #          block index ignores the row-tile axis -> resident per batch elem.
    # w_ref  : (3, Cip, 3*Cop)   bf16 weights, kw taps concatenated along N.
    # b_ref  : (1, Cop)          f32 bias
    # o_ref  : (1, TH, W, Cop)   output row tile
    # acc_ref: (TH*Wp, Cop)      f32 VMEM accumulator scratch
    th = o_ref.shape[1]
    w_out = o_ref.shape[2]
    cop = o_ref.shape[3]
    wp = x_ref.shape[2]
    cip = x_ref.shape[3]
    m = th * wp

    row0 = pl.multiple_of(pl.program_id(1) * th, th)

    for kh in range(3):
        # One load per kh along the untiled H axis (no relayout).
        xh = x_ref[0, pl.ds(row0 + kh, th), :, :]          # (TH, Wp, Cip) bf16
        xh = xh.reshape(m, cip)                            # layout-free: Wp % 16 == 0
        # Single wide MXU matmul covers all three kw taps for this kh.
        p_all = jnp.dot(xh, w_ref[kh], preferred_element_type=jnp.float32)
        # Column shifts = sublane rolls (XLU) of the f32 product; lane slices
        # are at multiples of 128 so they are tile-aligned (no relayout).
        part = p_all[:, 0:cop]
        part = part + pltpu.roll(p_all[:, cop:2 * cop], m - 1, axis=0)
        part = part + pltpu.roll(p_all[:, 2 * cop:3 * cop], m - 2, axis=0)
        if kh == 0:
            acc_ref[...] = part
        else:
            acc_ref[...] += part

    acc = acc_ref[...].reshape(th, wp, cop)[:, :w_out, :]  # drop width padding
    y = _apply_act(acc + b_ref[0, :][None, None, :], act)  # fused bias + act
    o_ref[0] = y.astype(o_ref.dtype)


def _conv3x3_pallas(xp, w_cat, b, *, th, out_w, act):
    n, hp, wp, cip = xp.shape
    cop = w_cat.shape[-1] // 3
    h = hp - 2
    grid = (n, h // th)
    kernel = functools.partial(_conv3x3_kernel, act=act)
    return pl.pallas_call(
        kernel,
        out_shape=jax.ShapeDtypeStruct((n, h, out_w, cop), jnp.float32),
        grid_spec=pltpu.PrefetchScalarGridSpec(
            num_scalar_prefetch=0,
            grid=grid,
            in_specs=[
                # Whole padded image per batch elem; index ignores hi -> fetched
                # once per n, resident across its row tiles.
                pl.BlockSpec((1, hp, wp, cip), lambda ni, hi: (ni, 0, 0, 0)),
                pl.BlockSpec((3, cip, 3 * cop), lambda ni, hi: (0, 0, 0)),
                pl.BlockSpec((1, cop), lambda ni, hi: (0, 0)),
            ],
            out_specs=pl.BlockSpec((1, th, out_w, cop),
                                   lambda ni, hi: (ni, hi, 0, 0)),
            scratch_shapes=[pltpu.VMEM((th * wp, cop), jnp.float32)],
        ),
        compiler_params=pltpu.CompilerParams(
            dimension_semantics=("parallel", "parallel"),
            vmem_limit_bytes=48 * 1024 * 1024,
        ),
    )(xp, w_cat, b)


# -----------------------------------------------------------------------------
# Pallas kernel: fused 1x1 conv + bias + act (flattened-pixel matmul).
# -----------------------------------------------------------------------------
def _conv1x1_kernel(x_ref, w_ref, b_ref, o_ref, *, act):
    # x_ref: (TM, Cip) bf16 pixels   w_ref: (Cip, Cop) bf16   b_ref: (1, Cop) f32
    y = jnp.dot(x_ref[...], w_ref[...], preferred_element_type=jnp.float32)
    y = _apply_act(y + b_ref[0, :][None, :], act)
    o_ref[...] = y.astype(o_ref.dtype)


def _conv1x1_pallas(xp, w, b, *, tm, act):
    mp, cip = xp.shape
    cop = w.shape[-1]
    kernel = functools.partial(_conv1x1_kernel, act=act)
    return pl.pallas_call(
        kernel,
        out_shape=jax.ShapeDtypeStruct((mp, cop), jnp.float32),
        grid_spec=pltpu.PrefetchScalarGridSpec(
            num_scalar_prefetch=0,
            grid=(mp // tm,),
            in_specs=[
                pl.BlockSpec((tm, cip), lambda i: (i, 0)),
                pl.BlockSpec((cip, cop), lambda i: (0, 0)),
                pl.BlockSpec((1, cop), lambda i: (0, 0)),
            ],
            out_specs=pl.BlockSpec((tm, cop), lambda i: (i, 0)),
        ),
        compiler_params=pltpu.CompilerParams(
            dimension_semantics=("parallel",),
            vmem_limit_bytes=48 * 1024 * 1024,
        ),
    )(xp, w, b)


# -----------------------------------------------------------------------------
# One-time weight prep (hoisted out of the per-call forward path).
# -----------------------------------------------------------------------------
def fuse_conv_bn(w_oihw, gamma, beta, mean, var, eps=1e-5):
    """Fold eval-mode BatchNorm into a (bias-free) conv: returns (w, b)."""
    std = jnp.sqrt(var + eps)
    scale = gamma / std
    return w_oihw * scale[:, None, None, None], beta - mean * scale


def _pack_3x3(w_oihw, bias, lane=LANE):
    """OIHW (Cout,Cin,3,3) -> (3, Cip, 3*Cop) bf16 with kw taps along N."""
    cout, cin = int(w_oihw.shape[0]), int(w_oihw.shape[1])
    cip, cop = _round_up(cin, lane), _round_up(cout, lane)
    w_hwio = jnp.transpose(w_oihw, (2, 3, 1, 0))                   # (3,3,Cin,Cout)
    w_hwio = jnp.pad(w_hwio, ((0, 0), (0, 0), (0, cip - cin), (0, cop - cout)))
    w_cat = jnp.transpose(w_hwio, (0, 2, 1, 3)).reshape(3, cip, 3 * cop)
    bias_p = jnp.pad(bias, (0, cop - cout)).astype(jnp.float32).reshape(1, cop)
    return w_cat.astype(jnp.bfloat16), bias_p, cout


def prepare_repconv_params(params, lane=LANE):
    """BN fold + 1x1->3x3 merge (exact RepVGG reparam) + layout pack."""
    (w3, g3, b3, m3, v3, w1, g1, b1, m1, v1) = params
    w3f, bias3 = fuse_conv_bn(w3, g3, b3, m3, v3)
    w1f, bias1 = fuse_conv_bn(w1, g1, b1, m1, v1)
    w_oihw = w3f + jnp.pad(w1f, ((0, 0), (0, 0), (1, 1), (1, 1)))
    return _pack_3x3(w_oihw, bias3 + bias1, lane)


def prepare_convbn3x3_params(w3, gamma, beta, mean, var, lane=LANE, eps=1e-5):
    wf, bias = fuse_conv_bn(w3, gamma, beta, mean, var, eps)
    return _pack_3x3(wf, bias, lane)


def prepare_convbn1x1_params(w1, gamma, beta, mean, var, lane=LANE, eps=1e-5):
    wf, bias = fuse_conv_bn(w1, gamma, beta, mean, var, eps)       # (Cout,Cin,1,1)
    cout, cin = int(wf.shape[0]), int(wf.shape[1])
    cip, cop = _round_up(cin, lane), _round_up(cout, lane)
    w_io = jnp.transpose(wf[:, :, 0, 0], (1, 0))                   # (Cin, Cout)
    w_io = jnp.pad(w_io, ((0, cip - cin), (0, cop - cout)))
    bias_p = jnp.pad(bias, (0, cop - cout)).astype(jnp.float32).reshape(1, cop)
    return w_io.astype(jnp.bfloat16), bias_p, cout


# -----------------------------------------------------------------------------
# Per-call forward paths (everything fuses into one jit with the pallas_call).
# -----------------------------------------------------------------------------
@functools.partial(jax.jit, static_argnames=("cout", "th", "act"))
def _conv3x3_forward_impl(x_nchw, w_cat, bias_p, *, cout, th, act):
    n, cin, h, w = x_nchw.shape
    cip = w_cat.shape[1]
    wp = _round_up(w + 2, 16)  # width padded so bf16 sublane tiling stays intact
    x = jnp.transpose(x_nchw, (0, 2, 3, 1))                        # NCHW -> NHWC
    x = jnp.pad(x, ((0, 0), (1, 1), (1, wp - w - 1), (0, cip - cin)))
    x = x.astype(jnp.bfloat16)
    out = _conv3x3_pallas(x, w_cat, bias_p, th=th, out_w=w, act=act)
    out = jnp.transpose(out[..., :cout], (0, 3, 1, 2))             # NHWC -> NCHW
    return out.astype(x_nchw.dtype)


@functools.partial(jax.jit, static_argnames=("cout", "tm", "act"))
def _conv1x1_forward_impl(x_nchw, w, bias_p, *, cout, tm, act):
    n, cin, h, wdt = x_nchw.shape
    cip = w.shape[0]
    m = n * h * wdt
    mp = _round_up(m, tm)
    x = jnp.transpose(x_nchw, (0, 2, 3, 1)).reshape(m, cin)
    x = jnp.pad(x, ((0, mp - m), (0, cip - cin))).astype(jnp.bfloat16)
    out = _conv1x1_pallas(x, w, bias_p, tm=tm, act=act)
    out = out[:m, :cout].reshape(n, h, wdt, cout)
    out = jnp.transpose(out, (0, 3, 1, 2))
    return out.astype(x_nchw.dtype)


def _pick_th(h, th):
    if th is not None and h % int(th) == 0:
        return int(th)
    return max(t for t in range(1, min(h, 32) + 1) if h % t == 0)


def repconv_forward(x_nchw, prepared, th=None):
    """RepConv forward (deploy=False, rbr_identity=None, act='relu')."""
    w_cat, bias_p, cout = prepared
    th = _pick_th(int(x_nchw.shape[2]), th)
    return _conv3x3_forward_impl(x_nchw, w_cat, bias_p,
                                 cout=int(cout), th=th, act="relu")


def convbnact3x3_forward(x_nchw, prepared, act="silu", th=None):
    """ConvBNAct(ksize=3, stride=1) forward, eval-mode BN folded."""
    w_cat, bias_p, cout = prepared
    th = _pick_th(int(x_nchw.shape[2]), th)
    return _conv3x3_forward_impl(x_nchw, w_cat, bias_p,
                                 cout=int(cout), th=th, act=act)


def convbnact1x1_forward(x_nchw, prepared, act="silu", tm=None):
    """ConvBNAct(ksize=1, stride=1) forward, eval-mode BN folded."""
    w, bias_p, cout = prepared
    n, _, h, wdt = x_nchw.shape
    m = n * h * wdt
    if tm is None:
        tm = min(512, _round_up(m, 8))
    return _conv1x1_forward_impl(x_nchw, w, bias_p,
                                 cout=int(cout), tm=int(tm), act=act)


if __name__ == "__main__":
    key = jax.random.PRNGKey(0)
    N, Cin, H, W = 2, 4, 16, 16
    keys = jax.random.split(key, 24)

    x = jax.random.normal(keys[0], (N, Cin, H, W), jnp.float32)

    def bn_params(k, c):
        ks = jax.random.split(k, 4)
        gamma = 1.0 + 0.1 * jax.random.normal(ks[0], (c,), jnp.float32)
        beta = 0.1 * jax.random.normal(ks[1], (c,), jnp.float32)
        mean = 0.1 * jax.random.normal(ks[2], (c,), jnp.float32)
        var = 0.5 + jnp.abs(jax.random.normal(ks[3], (c,), jnp.float32))
        return gamma, beta, mean, var

    def ref_conv_bn(xc, w_oihw, gamma, beta, mean, var, pad):
        y = lax.conv_general_dilated(
            xc, w_oihw, window_strides=(1, 1),
            padding=((pad, pad), (pad, pad)),
            dimension_numbers=("NCHW", "OIHW", "NCHW"))
        scale = gamma / jnp.sqrt(var + 1e-5)
        return y * scale[None, :, None, None] + (beta - mean * scale)[None, :, None, None]

    def silu(v):
        return v * (1.0 / (1.0 + jnp.exp(-v)))

    # ---- RepConv (3x3 + 1x1 rep-block, BN folded, act='relu') ---------------
    Cout = 4
    w3 = 0.2 * jax.random.normal(keys[1], (Cout, Cin, 3, 3), jnp.float32)
    w1 = 0.2 * jax.random.normal(keys[2], (Cout, Cin, 1, 1), jnp.float32)
    g3, b3, m3, v3 = bn_params(keys[3], Cout)
    g1, b1, m1, v1 = bn_params(keys[4], Cout)
    prepared_rep = prepare_repconv_params((w3, g3, b3, m3, v3, w1, g1, b1, m1, v1))
    out_rep = jax.block_until_ready(repconv_forward(x, prepared_rep, th=8))
    ref_rep = jnp.maximum(ref_conv_bn(x, w3, g3, b3, m3, v3, 1)
                          + ref_conv_bn(x, w1, g1, b1, m1, v1, 0), 0.0)
    assert out_rep.shape == (N, Cout, H, W)
    err = float(jnp.max(jnp.abs(out_rep - ref_rep)))
    assert jnp.allclose(out_rep, ref_rep, atol=5e-2, rtol=5e-2), err

    # ---- ConvBNAct ksize=3, act='swish' (conv2 of BasicBlock_3x3_Reverse_Depth)
    Ch = 8
    wc3 = 0.2 * jax.random.normal(keys[5], (Ch, Cin, 3, 3), jnp.float32)
    gc3, bc3, mc3, vc3 = bn_params(keys[6], Ch)
    prepared_c3 = prepare_convbn3x3_params(wc3, gc3, bc3, mc3, vc3)
    out_c3 = jax.block_until_ready(convbnact3x3_forward(x, prepared_c3, act="silu", th=8))
    ref_c3 = silu(ref_conv_bn(x, wc3, gc3, bc3, mc3, vc3, 1))
    assert out_c3.shape == (N, Ch, H, W)
    err = float(jnp.max(jnp.abs(out_c3 - ref_c3)))
    assert jnp.allclose(out_c3, ref_c3, atol=5e-2, rtol=5e-2), err

    # ---- ConvBNAct ksize=1, act='swish' (SPDepthCSPStage conv1 / conv3) -----
    C2 = 8
    wc1 = 0.2 * jax.random.normal(keys[7], (C2, Cin, 1, 1), jnp.float32)
    gc1, bc1, mc1, vc1 = bn_params(keys[8], C2)
    prepared_c1 = prepare_convbn1x1_params(wc1, gc1, bc1, mc1, vc1)
    out_c1 = jax.block_until_ready(convbnact1x1_forward(x, prepared_c1, act="silu"))
    ref_c1 = silu(ref_conv_bn(x, wc1, gc1, bc1, mc1, vc1, 0))
    assert out_c1.shape == (N, C2, H, W)
    err = float(jnp.max(jnp.abs(out_c1 - ref_c1)))
    assert jnp.allclose(out_c1, ref_c1, atol=5e-2, rtol=5e-2), err

    print("KERNEL_OK")
</pallas_src>

<mosaic_0001>
module attributes {stable_mosaic.version = 11 : i64} {
  func.func @_conv3x3_kernel(%arg0: i32, %arg1: i32, %arg2: memref<1x18x32x128xbf16, #tpu.memory_space<vmem>>, %arg3: memref<3x128x384xbf16, #tpu.memory_space<vmem>>, %arg4: memref<1x128xf32, #tpu.memory_space<vmem>>, %arg5: memref<1x8x16x128xf32, #tpu.memory_space<vmem>>, %arg6: memref<256x128xf32, #tpu.memory_space<vmem>>) attributes {dimension_semantics = [#tpu.dimension_semantics<parallel>, #tpu.dimension_semantics<parallel>], iteration_bounds = array<i64: 2, 2>, scalar_prefetch = 0 : i64, scratch_operands = 1 : i64, tpu.core_type = #tpu.core_type<tc>, window_params = [{transform_indices = @transform_0, window_bounds = array<i64: 1, 18, 32, 128>}, {pipeline_mode = #tpu.pipeline_mode<synchronous>, transform_indices = @transform_1, window_bounds = array<i64: 3, 128, 384>}, {pipeline_mode = #tpu.pipeline_mode<synchronous>, transform_indices = @transform_2, window_bounds = array<i64: 1, 128>}, {transform_indices = @transform_3, window_bounds = array<i64: 1, 8, 16, 128>}]} {
    %c8_i32 = arith.constant 8 : i32
    %0 = arith.muli %arg1, %c8_i32 : i32
    %1 = tpu.assume_multiple %0, 8 : i32
    %c0_i32 = arith.constant 0 : i32
    %2 = arith.addi %1, %c0_i32 : i32
    %c0 = arith.constant 0 : index
    %3 = arith.index_cast %2 : i32 to index
    %c0_0 = arith.constant 0 : index
    %c0_1 = arith.constant 0 : index
    %4 = vector.load %arg2[%c0, %3, %c0_0, %c0_1] : memref<1x18x32x128xbf16, #tpu.memory_space<vmem>>, vector<1x8x32x128xbf16>
    %5 = vector.shape_cast %4 : vector<1x8x32x128xbf16> to vector<8x32x128xbf16>
    %6 = vector.shape_cast %5 : vector<8x32x128xbf16> to vector<256x128xbf16>
    %c0_2 = arith.constant 0 : index
    %c0_3 = arith.constant 0 : index
    %c0_4 = arith.constant 0 : index
    %7 = vector.load %arg3[%c0_2, %c0_3, %c0_4] : memref<3x128x384xbf16, #tpu.memory_space<vmem>>, vector<1x128x384xbf16>
    %8 = vector.shape_cast %7 : vector<1x128x384xbf16> to vector<128x384xbf16>
    %cst = arith.constant dense<0.000000e+00> : vector<256x384xf32>
    %9 = tpu.matmul %6, %8, %cst {dimension_numbers = #tpu.dot_dimension_numbers<[1], [0], [0], [1], [0, 0, 1, 1], [], []>} : vector<256x128xbf16>, vector<128x384xbf16>, vector<256x384xf32> -> vector<256x384xf32>
    %10 = vector.extract_strided_slice %9 {offsets = [0, 0], sizes = [256, 128], strides = [1, 1]} : vector<256x384xf32> to vector<256x128xf32>
    %11 = vector.extract_strided_slice %9 {offsets = [0, 128], sizes = [256, 128], strides = [1, 1]} : vector<256x384xf32> to vector<256x128xf32>
    %c255_i32 = arith.constant 255 : i32
    %12 = tpu.dynamic_rotate %11 by %c255_i32 dim 0 : vector<256x128xf32>, i32 -> vector<256x128xf32>
    %13 = arith.addf %10, %12 : vector<256x128xf32>
    %14 = vector.extract_strided_slice %9 {offsets = [0, 256], sizes = [256, 128], strides = [1, 1]} : vector<256x384xf32> to vector<256x128xf32>
    %c254_i32 = arith.constant 254 : i32
    %15 = tpu.dynamic_rotate %14 by %c254_i32 dim 0 : vector<256x128xf32>, i32 -> vector<256x128xf32>
    %16 = arith.addf %13, %15 : vector<256x128xf32>
    %c0_5 = arith.constant 0 : index
    %c0_6 = arith.constant 0 : index
    %17 = vector.load %arg6[%c0_5, %c0_6] : memref<256x128xf32, #tpu.memory_space<vmem>>, vector<256x128xf32>
    tpu.vector_store %arg6[%c0_5, %c0_6], %16 {strides = array<i32>} : memref<256x128xf32, #tpu.memory_space<vmem>>, vector<256x128xf32>,
    %c1_i32 = arith.constant 1 : i32
    %18 = arith.addi %1, %c1_i32 : i32
    %c0_7 = arith.constant 0 : index
    %19 = arith.index_cast %18 : i32 to index
    %c0_8 = arith.constant 0 : index
    %c0_9 = arith.constant 0 : index
    %20 = vector.load %arg2[%c0_7, %19, %c0_8, %c0_9] : memref<1x18x32x128xbf16, #tpu.memory_space<vmem>>, vector<1x8x32x128xbf16>
    %21 = vector.shape_cast %20 : vector<1x8x32x128xbf16> to vector<8x32x128xbf16>
    %22 = vector.shape_cast %21 : vector<8x32x128xbf16> to vector<256x128xbf16>
    %c1 = arith.constant 1 : index
    %c0_10 = arith.constant 0 : index
    %c0_11 = arith.constant 0 : index
    %23 = vector.load %arg3[%c1, %c0_10, %c0_11] : memref<3x128x384xbf16, #tpu.memory_space<vmem>>, vector<1x128x384xbf16>
    %24 = vector.shape_cast %23 : vector<1x128x384xbf16> to vector<128x384xbf16>
    %cst_12 = arith.constant dense<0.000000e+00> : vector<256x384xf32>
    %25 = tpu.matmul %22, %24, %cst_12 {dimension_numbers = #tpu.dot_dimension_numbers<[1], [0], [0], [1], [0, 0, 1, 1], [], []>} : vector<256x128xbf16>, vector<128x384xbf16>, vector<256x384xf32> -> vector<256x384xf32>
    %26 = vector.extract_strided_slice %25 {offsets = [0, 0], sizes = [256, 128], strides = [1, 1]} : vector<256x384xf32> to vector<256x128xf32>
    %27 = vector.extract_strided_slice %25 {offsets = [0, 128], sizes = [256, 128], strides = [1, 1]} : vector<256x384xf32> to vector<256x128xf32>
    %c255_i32_13 = arith.constant 255 : i32
    %28 = tpu.dynamic_rotate %27 by %c255_i32_13 dim 0 : vector<256x128xf32>, i32 -> vector<256x128xf32>
    %29 = arith.addf %26, %28 : vector<256x128xf32>
    %30 = vector.extract_strided_slice %25 {offsets = [0, 256], sizes = [256, 128], strides = [1, 1]} : vector<256x384xf32> to vector<256x128xf32>
    %c254_i32_14 = arith.constant 254 : i32
    %31 = tpu.dynamic_rotate %30 by %c254_i32_14 dim 0 : vector<256x128xf32>, i32 -> vector<256x128xf32>
    %32 = arith.addf %29, %31 : vector<256x128xf32>
    %c0_15 = arith.constant 0 : index
    %c0_16 = arith.constant 0 : index
    %33 = vector.load %arg6[%c0_15, %c0_16] : memref<256x128xf32, #tpu.memory_space<vmem>>, vector<256x128xf32>
    %34 = arith.addf %33, %32 : vector<256x128xf32>
    %c0_17 = arith.constant 0 : index
    %c0_18 = arith.constant 0 : index
    %35 = vector.load %arg6[%c0_17, %c0_18] : memref<256x128xf32, #tpu.memory_space<vmem>>, vector<256x128xf32>
    tpu.vector_store %arg6[%c0_17, %c0_18], %34 {strides = array<i32>} : memref<256x128xf32, #tpu.memory_space<vmem>>, vector<256x128xf32>,
    %c2_i32 = arith.constant 2 : i32
    %36 = arith.addi %1, %c2_i32 : i32
    %c0_19 = arith.constant 0 : index
    %37 = arith.index_cast %36 : i32 to index
    %c0_20 = arith.constant 0 : index
    %c0_21 = arith.constant 0 : index
    %38 = vector.load %arg2[%c0_19, %37, %c0_20, %c0_21] : memref<1x18x32x128xbf16, #tpu.memory_space<vmem>>, vector<1x8x32x128xbf16>
    %39 = vector.shape_cast %38 : vector<1x8x32x128xbf16> to vector<8x32x128xbf16>
    %40 = vector.shape_cast %39 : vector<8x32x128xbf16> to vector<256x128xbf16>
    %c2 = arith.constant 2 : index
    %c0_22 = arith.constant 0 : index
    %c0_23 = arith.constant 0 : index
    %41 = vector.load %arg3[%c2, %c0_22, %c0_23] : memref<3x128x384xbf16, #tpu.memory_space<vmem>>, vector<1x128x384xbf16>
    %42 = vector.shape_cast %41 : vector<1x128x384xbf16> to vector<128x384xbf16>
    %cst_24 = arith.constant dense<0.000000e+00> : vector<256x384xf32>
    %43 = tpu.matmul %40, %42, %cst_24 {dimension_numbers = #tpu.dot_dimension_numbers<[1], [0], [0], [1], [0, 0, 1, 1], [], []>} : vector<256x128xbf16>, vector<128x384xbf16>, vector<256x384xf32> -> vector<256x384xf32>
    %44 = vector.extract_strided_slice %43 {offsets = [0, 0], sizes = [256, 128], strides = [1, 1]} : vector<256x384xf32> to vector<256x128xf32>
    %45 = vector.extract_strided_slice %43 {offsets = [0, 128], sizes = [256, 128], strides = [1, 1]} : vector<256x384xf32> to vector<256x128xf32>
    %c255_i32_25 = arith.constant 255 : i32
    %46 = tpu.dynamic_rotate %45 by %c255_i32_25 dim 0 : vector<256x128xf32>, i32 -> vector<256x128xf32>
    %47 = arith.addf %44, %46 : vector<256x128xf32>
    %48 = vector.extract_strided_slice %43 {offsets = [0, 256], sizes = [256, 128], strides = [1, 1]} : vector<256x384xf32> to vector<256x128xf32>
    %c254_i32_26 = arith.constant 254 : i32
    %49 = tpu.dynamic_rotate %48 by %c254_i32_26 dim 0 : vector<256x128xf32>, i32 -> vector<256x128xf32>
    %50 = arith.addf %47, %49 : vector<256x128xf32>
    %c0_27 = arith.constant 0 : index
    %c0_28 = arith.constant 0 : index
    %51 = vector.load %arg6[%c0_27, %c0_28] : memref<256x128xf32, #tpu.memory_space<vmem>>, vector<256x128xf32>
    %52 = arith.addf %51, %50 : vector<256x128xf32>
    %c0_29 = arith.constant 0 : index
    %c0_30 = arith.constant 0 : index
    %53 = vector.load %arg6[%c0_29, %c0_30] : memref<256x128xf32, #tpu.memory_space<vmem>>, vector<256x128xf32>
    tpu.vector_store %arg6[%c0_29, %c0_30], %52 {strides = array<i32>} : memref<256x128xf32, #tpu.memory_space<vmem>>, vector<256x128xf32>,
    %c0_31 = arith.constant 0 : index
    %c0_32 = arith.constant 0 : index
    %54 = vector.load %arg6[%c0_31, %c0_32] : memref<256x128xf32, #tpu.memory_space<vmem>>, vector<256x128xf32>
    %55 = vector.shape_cast %54 : vector<256x128xf32> to vector<8x32x128xf32>
    %56 = vector.extract_strided_slice %55 {offsets = [0, 0, 0], sizes = [8, 16, 128], strides = [1, 1, 1]} : vector<8x32x128xf32> to vector<8x16x128xf32>
    %c0_33 = arith.constant 0 : index
    %c0_34 = arith.constant 0 : index
    %57 = vector.load %arg4[%c0_33, %c0_34] : memref<1x128xf32, #tpu.memory_space<vmem>>, vector<1x128xf32>
    %58 = vector.shape_cast %57 : vector<1x128xf32> to vector<128xf32>
    %59 = vector.shape_cast %58 : vector<128xf32> to vector<1x1x128xf32>
    %60 = vector.broadcast %59 : vector<1x1x128xf32> to vector<8x16x128xf32>
    %61 = arith.addf %56, %60 : vector<8x16x128xf32>
    %cst_35 = arith.constant 0.000000e+00 : f32
    %62 = vector.broadcast %cst_35 : f32 to vector<8x16x128xf32>
    %63 = arith.maximumf %61, %62 : vector<8x16x128xf32>
    %c0_36 = arith.constant 0 : index
    %c0_37 = arith.constant 0 : index
    %c0_38 = arith.constant 0 : index
    %c0_39 = arith.constant 0 : index
    %64 = vector.load %arg5[%c0_36, %c0_37, %c0_38, %c0_39] : memref<1x8x16x128xf32, #tpu.memory_space<vmem>>, vector<1x8x16x128xf32>
    %65 = vector.shape_cast %64 : vector<1x8x16x128xf32> to vector<8x16x128xf32>
    %66 = vector.shape_cast %63 : vector<8x16x128xf32> to vector<1x8x16x128xf32>
    tpu.vector_store %arg5[%c0_36, %c0_37, %c0_38, %c0_39], %66 {strides = array<i32>} : memref<1x8x16x128xf32, #tpu.memory_space<vmem>>, vector<1x8x16x128xf32>,
    return
  }
  func.func @transform_0(%arg0: i32, %arg1: i32) -> (i32, i32, i32, i32) {
    %c0_i32 = arith.constant 0 : i32
    %c0_i32_0 = arith.constant 0 : i32
    %c0_i32_1 = arith.constant 0 : i32
    %c0_i32_2 = arith.constant 0 : i32
    return %arg0, %c0_i32, %c0_i32_0, %c0_i32_1 : i32, i32, i32, i32
  }
  func.func @transform_1(%arg0: i32, %arg1: i32) -> (i32, i32, i32) {
    %c0_i32 = arith.constant 0 : i32
    %c0_i32_0 = arith.constant 0 : i32
    %c0_i32_1 = arith.constant 0 : i32
    %c0_i32_2 = arith.constant 0 : i32
    return %c0_i32, %c0_i32_0, %c0_i32_1 : i32, i32, i32
  }
  func.func @transform_2(%arg0: i32, %arg1: i32) -> (i32, i32) {
    %c0_i32 = arith.constant 0 : i32
    %c0_i32_0 = arith.constant 0 : i32
    %c0_i32_1 = arith.constant 0 : i32
    return %c0_i32, %c0_i32_0 : i32, i32
  }
  func.func @transform_3(%arg0: i32, %arg1: i32) -> (i32, i32, i32, i32) {
    %c0_i32 = arith.constant 0 : i32
    %c0_i32_0 = arith.constant 0 : i32
    %c0_i32_1 = arith.constant 0 : i32
    return %arg0, %arg1, %c0_i32, %c0_i32_0 : i32, i32, i32, i32
  }
}

</mosaic_0001>

<bundles_post_ra>
// kernel: _conv3x3_forward_impl.1
= control target key start
LH: loop header
LB: loop body
LE: loop exit
PB: predicated region body
PF: predicated region fallthrough
CT: control target
= control target key end

     0   :  { %s3863_s12 = smov 0   ;;  %s3865_s13 = smov 0   ;;  %s4704_s0 = inlined_call_operand.vmem [shape: bf16[2,18,32,128], index: 0, kind: input, shape index: {}]   ;;  %s4705_s1 = inlined_call_operand.vmem [shape: bf16[3,128,384], index: 1, kind: input, shape index: {}]   ;;  %s4706_s2 = inlined_call_operand.vmem [shape: f32[1,128], index: 2, kind: input, shape index: {}]   ;;  %s4707_s3 = inlined_call_operand.vmem [shape: f32[2,16,16,128], index: 3, kind: output, shape index: {}]  }
   0x1   :  { %s3867_s14 = smov 0   ;;  %s3869_s15 = smov 0  }
   0x2   :  { %s3871_s16 = smov 0  }
   0x3 LB: > { %s22_s17 = sadd.s32 1, %s3832_s14  ;;  %s25_s18 = sadd.s32 1, %s3836_s15  ;;  %s3840_s16 = sphi %s3871_s16, %s13_s16   ;;  %s3836_s15 = sphi %s3869_s15, %s4711_s15   ;;  %s3832_s14 = sphi %s3867_s14, %s4710_s14   ;;  %s3828_s13 = sphi %s3865_s13, %s4709_s13   ;;  %s3824_s12 = sphi %s3863_s12, %s4708_s12  }
   0x4   : > { %p23_p0 = scmp.ge.s32.totalorder %s22_s17, 2  ;;  %p3116_p1 = scmp.ge.s32.totalorder %s3840_s16, 1 }
   0x5   : > { %p151_p2 = scmp.lt.s32.totalorder %s3840_s16, 5 }
   0x6   : > { %s4713_s17 = smov (%p23_p0, %s22_s17), 0  ;;  %s4715_s18 = smov (!%p23_p0, %s25_s18), %s3836_s15 }
   0x7   : > { %p152_p3 = pnand %p3116_p1, %p151_p2  ;;  %p27_p4 = scmp.ge.s32.totalorder %s4715_s18, 2 }
   0x8   : > { %v3658_v0 = vld [vmem:[%s4705_s1 + $0x4] ss:$12 sps:$4 sm:$0xff] (!%p152_p3)   ;;  %p180_p5 = scmp.lt.s32.totalorder (!%p152_p3), %s3828_s13, 1  ;;  %v3660_v1 = vld [vmem:[%s4705_s1] ss:$12 sps:$4 sm:$0xff] (!%p152_p3)   ;;  %v3842_v2 = vmov (!%p152_p3), 0  }
   0x9   : > { %s4717_s18 = smov (%p27_p4, %s4715_s18), 0  ;;  %155 = sbr.rel (%p152_p3) target bundleno = 550 (0x226), region = 32 }
   0xa   : > { %521 = vmatprep.mubr.bf16.mxu0 (!%p152_p3), %v3842_v2  ;;  %641 = vmatprep.mubr.bf16.mxu1 (!%p152_p3), %v3842_v2  ;;  %v3661_v3 = vld [vmem:[%s4705_s1 + $0x1c] ss:$12 sps:$4 sm:$0xff] (!%p152_p3)   ;;  %v3663_v4 = vld [vmem:[%s4705_s1 + $0x18] ss:$12 sps:$4 sm:$0xff] (!%p152_p3)   ;;  %v3664_v5 = vld [vmem:[%s4705_s1 + $0x34] ss:$12 sps:$4 sm:$0xff] (!%p152_p3)  }
   0xb   : > { %489 = vmatprep.subr.bf16.mxu0 (!%p152_p3), %v3658_v0  ;;  %3600 = vmatprep.subr.bf16.mxu1 (!%p152_p3), %v3658_v0  ;;  %s3381_s6 = sshll.u32 (!%p152_p3), %s3824_s12, 7  ;;  %v3666_v6 = vld [vmem:[%s4705_s1 + $0x30] ss:$12 sps:$4 sm:$0xff] (!%p152_p3)   ;;  %v3667_v7 = vld [vmem:[%s4705_s1 + $0x4c] ss:$12 sps:$4 sm:$0xff] (!%p152_p3)  }
   0xc   : > { %490 = vmatpush1.bf16.msra.mxu0 (!%p152_p3), %v3660_v1  ;;  %3608 = vmatpush1.bf16.msra.mxu1 (!%p152_p3), %v3660_v1  ;;  %v3669_v8 = vld [vmem:[%s4705_s1 + $0x48] ss:$12 sps:$4 sm:$0xff] (!%p152_p3)   ;;  %v3670_v9 = vld [vmem:[%s4705_s1 + $0x64] ss:$12 sps:$4 sm:$0xff] (!%p152_p3)   ;;  %v3672_v10 = vld [vmem:[%s4705_s1 + $0x60] ss:$12 sps:$4 sm:$0xff] (!%p152_p3)  }
   0xd   : > { %491 = vmatprep.subr.bf16.mxu0 (!%p152_p3), %v3661_v3  ;;  %3601 = vmatprep.subr.bf16.mxu1 (!%p152_p3), %v3661_v3  ;;  %v3673_v11 = vld [vmem:[%s4705_s1 + $0x7c] ss:$12 sps:$4 sm:$0xff] (!%p152_p3)   ;;  %v3675_v12 = vld [vmem:[%s4705_s1 + $0x78] ss:$12 sps:$4 sm:$0xff] (!%p152_p3)   ;;  %v3676_v13 = vld [vmem:[%s4705_s1 + $0x94] ss:$12 sps:$4 sm:$0xff] (!%p152_p3)  }
   0xe   : > { %v3678_v14 = vld [vmem:[%s4705_s1 + $0x90] ss:$12 sps:$4 sm:$0xff] (!%p152_p3)   ;;  %v3679_v15 = vld [vmem:[%s4705_s1 + $0xac] ss:$12 sps:$4 sm:$0xff] (!%p152_p3)   ;;  %v3681_v16 = vld [vmem:[%s4705_s1 + $0xa8] ss:$12 sps:$4 sm:$0xff] (!%p152_p3)  }
   0xf   : > { %v3684_v17 = vld [vmem:[%s4705_s1 + $0x8] ss:$12 sps:$4 sm:$0xff] (!%p152_p3)   ;;  %v3686_v21 = vld [vmem:[%s4705_s1 + $0x20] ss:$12 sps:$4 sm:$0xff] (!%p152_p3)   ;;  %v3689_v23 = vld [vmem:[%s4705_s1 + $0x38] ss:$12 sps:$4 sm:$0xff] (!%p152_p3)  }
  0x10   : > { %s4719_s13 = smov (!%p180_p5, %s3828_s13), 1  ;;  %492 = vmatpush1.bf16.msra.mxu0 %v3663_v4  ;;  %3609 = vmatpush1.bf16.msra.mxu1 %v3663_v4  ;;  %v3685_v18 = vld [vmem:[%s4705_s1 + $0xc8] ss:$12 sps:$4 sm:$0xff]   ;;  %v3691_v22 = vld [vmem:[%s4705_s1 + $0xe0] ss:$12 sps:$4 sm:$0xff]  }
  0x11   : > { %s3616_s29 = smul.u32 288, %s4719_s13  ;;  %493 = vmatprep.subr.bf16.mxu0 %v3664_v5  ;;  %3602 = vmatprep.subr.bf16.mxu1 %v3664_v5  ;;  %v3699_v24 = vld [vmem:[%s4705_s1 + $0xf8] ss:$12 sps:$4 sm:$0xff]   ;;  %v3690_v27 = vld [vmem:[%s4705_s1 + $0x50] ss:$12 sps:$4 sm:$0xff]   ;;  %s3120_s8 = sshll.u32 %s4719_s13, 5 }
  0x12   : > { %v3705_v28 = vld [vmem:[%s4705_s1 + $0x110] ss:$12 sps:$4 sm:$0xff]   ;;  %v3694_v29 = vld [vmem:[%s4705_s1 + $0x68] ss:$12 sps:$4 sm:$0xff]   ;;  %v3695_v32 = vld [vmem:[%s4705_s1 + $0x80] ss:$12 sps:$4 sm:$0xff]  }
  0x13   : > { %s184_s5 = scalar_lea.vmem %s4704_s0, %s3616_s29  ;;  %v3714_v33 = vld [vmem:[%s4705_s1 + $0x128] ss:$12 sps:$4 sm:$0xff]   ;;  %v3719_v34 = vld [vmem:[%s4705_s1 + $0x140] ss:$12 sps:$4 sm:$0xff]   ;;  %v3698_v35 = vld [vmem:[%s4705_s1 + $0x98] ss:$12 sps:$4 sm:$0xff]  }
  0x14   : > { %s3925_s11 = scalar_lea.vmem %s184_s5, %s3381_s6  ;;  %494 = vmatpush1.bf16.msra.mxu0 %v3666_v6  ;;  %3610 = vmatpush1.bf16.msra.mxu1 %v3666_v6  ;;  %v3700_v38 = vld [vmem:[%s4705_s1 + $0xb0] ss:$12 sps:$4 sm:$0xff]   ;;  %v3730_v39 = vld [vmem:[%s4705_s1 + $0x158] ss:$12 sps:$4 sm:$0xff]   ;;  %v3702_v42 = vld [vmem:[%s4705_s1 + $0xc0] ss:$12 sps:$4 sm:$0xff]  }
  0x15   : > { %495 = vmatprep.subr.bf16.mxu0 %v3667_v7  ;;  %3603 = vmatprep.subr.bf16.mxu1 %v3667_v7  ;;  %v3961_v19 = vld [vmem:[%s3925_s11] sm:$0xff]   ;;  %v3687_v25 = vld [vmem:[%s3925_s11 + $0x8] sm:$0xff]   ;;  %v3692_v30 = vld [vmem:[%s3925_s11 + $0x10] sm:$0xff]  }
  0x16   : > { %v3964_v20 = vld [vmem:[%s3925_s11 + $0x60] sm:$0xff]   ;;  %v3984_v26 = vld [vmem:[%s3925_s11 + $0x68] sm:$0xff]   ;;  %v4000_v31 = vld [vmem:[%s3925_s11 + $0x70] sm:$0xff]  }
  0x17   : > { %v3696_v36 = vld [vmem:[%s3925_s11 + $0x18] sm:$0xff]   ;;  %v3704_v40 = vld [vmem:[%s4705_s1 + $0xc4] ss:$12 sps:$4 sm:$0xff]   ;;  %v3713_v47 = vld [vmem:[%s4705_s1 + $0xf4] ss:$12 sps:$4 sm:$0xff]  }
  0x18   : > { %496 = vmatpush1.bf16.msra.mxu0 %v3669_v8  ;;  %3611 = vmatpush1.bf16.msra.mxu1 %v3669_v8  ;;  %v4019_v37 = vld [vmem:[%s3925_s11 + $0x78] sm:$0xff]   ;;  %v3701_v41 = vld [vmem:[%s3925_s11 + $0x20] sm:$0xff]   ;;  %v3706_v48 = vld [vmem:[%s3925_s11 + $0x28] sm:$0xff]  }
  0x19   : > { %497 = vmatprep.subr.bf16.mxu0 %v3670_v9  ;;  %3604 = vmatprep.subr.bf16.mxu1 %v3670_v9  ;;  %v3709_v43 = vld [vmem:[%s4705_s1 + $0xdc] ss:$12 sps:$4 sm:$0xff]   ;;  %v3707_v45 = vld [vmem:[%s4705_s1 + $0xd8] ss:$12 sps:$4 sm:$0xff]   ;;  %v3710_v53 = vld [vmem:[%s3925_s11 + $0x30] sm:$0xff]  }
  0x1a   : > { %v3734_v44 = vld [vmem:[%s4705_s1 + $0x170] ss:$12 sps:$4 sm:$0xff]   ;;  %v3718_v50 = vld [vmem:[%s4705_s1 + $0x10c] ss:$12 sps:$4 sm:$0xff]   ;;  %v3716_v51 = vld [vmem:[%s4705_s1 + $0x108] ss:$12 sps:$4 sm:$0xff]  }
  0x1b   : > { %v3742_v46 = vld [vmem:[%s4705_s1 + $0x184] ss:$12 sps:$4 sm:$0xff]   ;;  %v3722_v54 = vld [vmem:[%s4705_s1 + $0x120] ss:$12 sps:$4 sm:$0xff]   ;;  %v3729_v55 = vld [vmem:[%s4705_s1 + $0x13c] ss:$12 sps:$4 sm:$0xff]  }
  0x1c   : > { %498 = vmatpush1.bf16.msra.mxu0 %v3672_v10  ;;  %3612 = vmatpush1.bf16.msra.mxu1 %v3672_v10  ;;  %v3711_v49 = vld [vmem:[%s4705_s1 + $0xf0] ss:$12 sps:$4 sm:$0xff]   ;;  %v3727_v56 = vld [vmem:[%s4705_s1 + $0x138] ss:$12 sps:$4 sm:$0xff]   ;;  %v3733_v57 = vld [vmem:[%s4705_s1 + $0x154] ss:$12 sps:$4 sm:$0xff]  }
  0x1d   : > { %499 = vmatprep.subr.bf16.mxu0 %v3673_v11  ;;  %3605 = vmatprep.subr.bf16.mxu1 %v3673_v11  ;;  %v3724_v52 = vld [vmem:[%s4705_s1 + $0x124] ss:$12 sps:$4 sm:$0xff]   ;;  %v3715_v58 = vld [vmem:[%s3925_s11 + $0x38] sm:$0xff]   ;;  %v3735_v62 = vld [vmem:[%s4705_s1 + $0x168] ss:$12 sps:$4 sm:$0xff]  }
  0x1e   : > { %v3720_v59 = vld [vmem:[%s3925_s11 + $0x40] sm:$0xff]   ;;  %v3731_v60 = vld [vmem:[%s4705_s1 + $0x150] ss:$12 sps:$4 sm:$0xff]   ;;  %v3737_v61 = vld [vmem:[%s4705_s1 + $0x16c] ss:$12 sps:$4 sm:$0xff]  }
  0x1f   : > { %v3743_v63 = vld [vmem:[%s4705_s1 + $0x188] ss:$12 sps:$4 sm:$0xff]   ;;  %v3726_v3 = vld [vmem:[%s3925_s11 + $0x58] sm:$0xff]   ;;  %v3740_v6 = vld [vmem:[%s4705_s1 + $0x180] ss:$12 sps:$4 sm:$0xff]  }
  0x20   : > { %500 = vmatpush1.bf16.msra.mxu0 %v3675_v12  ;;  %3613 = vmatpush1.bf16.msra.mxu1 %v3675_v12  ;;  %v3721_v0 = vld [vmem:[%s3925_s11 + $0x48] sm:$0xff]   ;;  %v3725_v1 = vld [vmem:[%s3925_s11 + $0x50] sm:$0xff]   ;;  %v3739_v5 = vld [vmem:[%s3925_s11 + $0x18] sm:$0xff]  }
  0x21   : > { %501 = vmatprep.subr.bf16.mxu0 %v3676_v13  ;;  %3606 = vmatprep.subr.bf16.mxu1 %v3676_v13  ;;  %v3738_v4 = vld [vmem:[%s3925_s11 + $0x10] sm:$0xff]   ;;  %v3744_v7 = vld [vmem:[%s3925_s11 + $0x20] sm:$0xff]   ;;  %v3748_v8 = vld [vmem:[%s4705_s1 + $0x19c] ss:$12 sps:$4 sm:$0xff]  }
  0x22   : > { %v3754_v9 = vld [vmem:[%s4705_s1 + $0x1a0] ss:$12 sps:$4 sm:$0xff]   ;;  %v3746_v10 = vld [vmem:[%s4705_s1 + $0x198] ss:$12 sps:$4 sm:$0xff]  }
  0x23   : > { %v3753_v11 = vld [vmem:[%s4705_s1 + $0x1b4] ss:$12 sps:$4 sm:$0xff]   ;;  %v3765_v12 = vld [vmem:[%s4705_s1 + $0x1b8] ss:$12 sps:$4 sm:$0xff]   ;;  %v3745_v13 = vld [vmem:[%s3925_s11 + $0x28] sm:$0xff]  }
  0x24   : > { %502 = vmatpush1.bf16.msra.mxu0 %v3678_v14  ;;  %3614 = vmatpush1.bf16.msra.mxu1 %v3678_v14  ;;  %v3749_v14 = vld [vmem:[%s3925_s11 + $0x30] sm:$0xff]  }
  0x25   : > { %503 = vmatprep.subr.bf16.mxu0 %v3679_v15  ;;  %3607 = vmatprep.subr.bf16.mxu1 %v3679_v15  ;;  %v3751_v15 = vld [vmem:[%s4705_s1 + $0x1b0] ss:$12 sps:$4 sm:$0xff]  }
  0x28   : > { %504 = vmatpush1.bf16.msra.mxu0 %v3681_v16  ;;  %3615 = vmatpush1.bf16.msra.mxu1 %v3681_v16  ;;  %v3759_v16 = vld [vmem:[%s4705_s1 + $0x1cc] ss:$12 sps:$4 sm:$0xff]  }
  0x29   : > { %3456 = vmatprep.subr.bf16.mxu1 %v3684_v17  ;;  %3504 = vmatprep.subr.bf16.mxu0 %v3685_v18 }
  0x2b   : > { %522 = vmatmul.mubr.bf16.vlgmr.msra.gmra.mrb[0].mxu0 %v3961_v19  ;;  %642 = vmatmul.mubr.bf16.vlgmr.msra.gmra.mrb[0].mxu1 %v3964_v20 }
  0x2c   : > { %3457 = vmatpush3.bf16.msra.mxu1 %v3684_v17  ;;  %3505 = vmatpush3.bf16.msra.mxu0 %v3685_v18  ;;  %v3776_v17 = vld [vmem:[%s4705_s1 + $0x1d0] ss:$12 sps:$4 sm:$0xff]   ;;  %v3757_v18 = vld [vmem:[%s4705_s1 + $0x1c8] ss:$12 sps:$4 sm:$0xff]  }
  0x2d   : > { %3458 = vmatprep.subr.bf16.mxu1 %v3686_v21  ;;  %531 = vmatprep.mubr.bf16.mxu0 %v3842_v2 }
  0x2e   : > { %651 = vmatprep.mubr.bf16.mxu1 %v3842_v2  ;;  %3506 = vmatprep.subr.bf16.mxu0 %v3691_v22 }
  0x30   : > { %3459 = vmatpush3.bf16.msra.mxu1 %v3686_v21  ;;  %3507 = vmatpush3.bf16.msra.mxu0 %v3691_v22  ;;  %v3750_v21 = vld [vmem:[%s3925_s11 + $0x38] sm:$0xff]   ;;  %v3755_v22 = vld [vmem:[%s3925_s11 + $0x40] sm:$0xff]  }
  0x31   : > { %3460 = vmatprep.subr.bf16.mxu1 %v3689_v23  ;;  %3508 = vmatprep.subr.bf16.mxu0 %v3699_v24 }
  0x33   : > { %532 = vmatmul.mubr.bf16.gmra.mrb[4].mxu0 %v3687_v25  ;;  %652 = vmatmul.mubr.bf16.gmra.mrb[4].mxu1 %v3984_v26 }
  0x34   : > { %3461 = vmatpush3.bf16.msra.mxu1 %v3689_v23  ;;  %541 = vmatprep.mubr.bf16.mxu0 %v3842_v2  ;;  %v3762_v23 = vld [vmem:[%s4705_s1 + $0x1e0] ss:$12 sps:$4 sm:$0xff]  }
  0x35   : > { %3462 = vmatprep.subr.bf16.mxu1 %v3690_v27  ;;  %661 = vmatprep.mubr.bf16.mxu1 %v3842_v2 }
  0x36   : > { %3509 = vmatpush3.bf16.msra.mxu0 %v3699_v24  ;;  %v3770_v24 = vld [vmem:[%s4705_s1 + $0x1fc] ss:$12 sps:$4 sm:$0xff]  }
  0x37   : > { %3510 = vmatprep.subr.bf16.mxu0 %v3705_v28 }
  0x38   : > { %3463 = vmatpush3.bf16.msra.mxu1 %v3690_v27  ;;  %v3775_v27 = vld [vmem:[%s4705_s1 + $0x214] ss:$12 sps:$4 sm:$0xff]  }
  0x39   : > { %3464 = vmatprep.subr.bf16.mxu1 %v3694_v29 }
  0x3a   : > { %3511 = vmatpush3.bf16.msra.mxu0 %v3705_v28  ;;  %v3789_v28 = vld [vmem:[%s4705_s1 + $0x218] ss:$12 sps:$4 sm:$0xff]  }
  0x3b   : > { %542 = vmatmul.mubr.bf16.gmra.mrb[8].mxu0 %v3692_v30  ;;  %662 = vmatmul.mubr.bf16.gmra.mrb[8].mxu1 %v4000_v31 }
  0x3c   : > { %3465 = vmatpush3.bf16.msra.mxu1 %v3694_v29  ;;  %551 = vmatprep.mubr.bf16.mxu0 %v3842_v2  ;;  %v3756_v29 = vld [vmem:[%s3925_s11 + $0x48] sm:$0xff]  }
  0x3d   : > { %3466 = vmatprep.subr.bf16.mxu1 %v3695_v32  ;;  %671 = vmatprep.mubr.bf16.mxu1 %v3842_v2 }
  0x3e   : > { %3512 = vmatprep.subr.bf16.mxu0 %v3714_v33 }
  0x3f   : > { %3513 = vmatpush3.bf16.msra.mxu0 %v3714_v33  ;;  %v3792_v33 = vld [vmem:[%s4705_s1 + $0x230] ss:$12 sps:$4 sm:$0xff]  }
  0x40   : > { %3467 = vmatpush3.bf16.msra.mxu1 %v3695_v32  ;;  %3514 = vmatprep.subr.bf16.mxu0 %v3719_v34  ;;  %v3781_v32 = vld [vmem:[%s4705_s1 + $0x22c] ss:$12 sps:$4 sm:$0xff]  }
  0x41   : > { %3468 = vmatprep.subr.bf16.mxu1 %v3698_v35 }
  0x43   : > { %552 = vmatmul.mubr.bf16.gmra.mrb[12].mxu0 %v3696_v36  ;;  %672 = vmatmul.mubr.bf16.gmra.mrb[12].mxu1 %v4019_v37 }
  0x44   : > { %3469 = vmatpush3.bf16.msra.mxu1 %v3698_v35  ;;  %561 = vmatprep.mubr.bf16.mxu0 %v3842_v2  ;;  %v3761_v35 = vld [vmem:[%s3925_s11 + $0x58] sm:$0xff]  }
  0x45   : > { %3470 = vmatprep.subr.bf16.mxu1 %v3700_v38  ;;  %3472 = vmatprep.mubr.bf16.mxu1 %v3961_v19  ;;  %v3764_v19 = vld [vmem:[%s4705_s1 + $0x1e4] ss:$12 sps:$4 sm:$0xff]  }
  0x46   : > { %3515 = vmatpush3.bf16.msra.mxu0 %v3719_v34  ;;  %v3779_v34 = vld [vmem:[%s4705_s1 + $0x228] ss:$12 sps:$4 sm:$0xff]  }
  0x47   : > { %3516 = vmatprep.subr.bf16.mxu0 %v3730_v39 }
  0x48   : > { %3471 = vmatpush3.bf16.msra.mxu1 %v3700_v38  ;;  %v3771_v38 = vld [vmem:[%s3925_s11 + $0x70] sm:$0xff]  }
  0x49   : > { %1364 = vmatprep.subr.bf16.mxu1 %v3704_v40  ;;  %v3777_v40 = vld [vmem:[%s3925_s11 + $0x80] sm:$0xff]  }
  0x4a   : > { %3517 = vmatpush3.bf16.msra.mxu0 %v3730_v39  ;;  %v3772_v39 = vld [vmem:[%s3925_s11 + $0x78] sm:$0xff]  }
  0x4b   : > { %562 = vmatmul.mubr.bf16.gmra.mrb[16].mxu0 %v3701_v41  ;;  %3473 = vmatmul.mubr.bf16.vlgmr.msra.gmra.mrb[16].mxu1 %v3687_v25  ;;  %v3786_v25 = vld [vmem:[%s4705_s1 + $0x200] ss:$12 sps:$4 sm:$0xff]  }
  0x4c   : > { %1365 = vmatpush1.bf16.msra.mxu1 %v3702_v42  ;;  %571 = vmatprep.mubr.bf16.mxu0 %v3842_v2  ;;  %v3782_v42 = vld [vmem:[%s3925_s11 + $0x20] sm:$0xff]  }
  0x4d   : > { %3476 = vmatprep.mubr.bf16.mxu1 %v3692_v30  ;;  %1366 = vmatprep.subr.bf16.mxu1 %v3709_v43  ;;  %v3760_v30 = vld [vmem:[%s3925_s11 + $0x50] sm:$0xff]   ;;  %v4202_v43 = vld [vmem:[%s3925_s11 + $0x28] sm:$0xff]  }
  0x4e   : > { %3518 = vmatprep.subr.bf16.mxu0 %v3734_v44 }
  0x4f   : > { %3519 = vmatpush3.bf16.msra.mxu0 %v3734_v44  ;;  %v4208_v44 = vld [vmem:[%s3925_s11 + $0x30] sm:$0xff]  }
  0x50   : > { %1367 = vmatpush1.bf16.msra.mxu1 %v3707_v45  ;;  %2299 = vmatprep.subr.bf16.mxu0 %v3742_v46  ;;  %v4214_v45 = vld [vmem:[%s3925_s11 + $0x38] sm:$0xff]   ;;  %v4220_v46 = vld [vmem:[%s3925_s11 + $0x40] sm:$0xff]  }
  0x51   : > { %1368 = vmatprep.subr.bf16.mxu1 %v3713_v47  ;;  %v4226_v47 = vld [vmem:[%s3925_s11 + $0x48] sm:$0xff]  }
  0x53   : > { %572 = vmatmul.mubr.bf16.gmra.mrb[20].mxu0 %v3706_v48  ;;  %3477 = vmatmul.mubr.bf16.gmra.mrb[20].mxu1 %v3696_v36  ;;  %v3766_v36 = vld [vmem:[%s3925_s11 + $0x60] sm:$0xff]  }
  0x54   : > { %581 = vmatprep.mubr.bf16.mxu0 %v3842_v2  ;;  %3480 = vmatprep.mubr.bf16.mxu1 %v3701_v41  ;;  %v3778_v41 = vld [vmem:[%s3925_s11 + $0x88] sm:$0xff]  }
  0x55   : > { %1369 = vmatpush1.bf16.msra.mxu1 %v3711_v49  ;;  %v875_v49 = vlaneseq }
  0x56   : > { %1370 = vmatprep.subr.bf16.mxu1 %v3718_v50 }
  0x57   : > { %v4237_v50 = vshrl.u32 %v875_v49, 7 }
  0x59   : > { %1371 = vmatpush1.bf16.msra.mxu1 %v3716_v51  ;;  %vm877_vm0 = vcmp.lt.s32.totalorder %v4237_v50, 7  ;;  %vm974_vm1 = vcmp.lt.s32.totalorder %v4237_v50, 6 }
  0x5a   : > { %1372 = vmatprep.subr.bf16.mxu1 %v3724_v52 }
  0x5b   : > { %582 = vmatmul.mubr.bf16.gmra.mrb[24].mxu0 %v3710_v53  ;;  %3481 = vmatmul.mubr.bf16.gmra.mrb[24].mxu1 %v3706_v48  ;;  %v4232_v48 = vld [vmem:[%s3925_s11 + $0x50] sm:$0xff]  }
  0x5c   : > { %591 = vmatprep.mubr.bf16.mxu0 %v3842_v2  ;;  %3484 = vmatprep.mubr.bf16.mxu1 %v3710_v53 }
  0x5d   : > { %1373 = vmatpush1.bf16.msra.mxu1 %v3722_v54 }
  0x5e   : > { %1374 = vmatprep.subr.bf16.mxu1 %v3729_v55  ;;  %v4240_v55 = vld [vmem:[%s3925_s11 + $0x58] sm:$0xff]  }
  0x61   : > { %1375 = vmatpush1.bf16.msra.mxu1 %v3727_v56 }
  0x62   : > { %1376 = vmatprep.subr.bf16.mxu1 %v3733_v57 }
  0x63   : > { %592 = vmatmul.mubr.bf16.gmra.mrb[28].mxu0 %v3715_v58  ;;  %3485 = vmatmul.mubr.bf16.gmra.mrb[28].mxu1 %v3715_v58 }
  0x64   : > { %601 = vmatprep.mubr.bf16.mxu0 %v3842_v2  ;;  %3488 = vmatprep.mubr.bf16.mxu1 %v3720_v59 }
  0x65   : > { %1377 = vmatpush1.bf16.msra.mxu1 %v3731_v60 }
  0x66   : > { %1378 = vmatprep.subr.bf16.mxu1 %v3737_v61 }
  0x69   : > { %1379 = vmatpush1.bf16.msra.mxu1 %v3735_v62 }
  0x6a   : > { %3552 = vmatprep.subr.bf16.mxu1 %v3743_v63 }
  0x6b   : > { %602 = vmatmul.mubr.bf16.gmra.mrb[32].mxu0 %v3720_v59  ;;  %3489 = vmatmul.mubr.bf16.gmra.mrb[32].mxu1 %v3721_v0 }
  0x6c   : > { %611 = vmatprep.mubr.bf16.mxu0 %v3842_v2  ;;  %3492 = vmatprep.mubr.bf16.mxu1 %v3725_v1 }
  0x73   : > { %612 = vmatmul.mubr.bf16.gmra.mrb[36].mxu0 %v3721_v0  ;;  %3493 = vmatmul.mubr.bf16.gmra.mrb[36].mxu1 %v3726_v3 }
  0x74   : > { %621 = vmatprep.mubr.bf16.mxu0 %v3842_v2  ;;  %3496 = vmatprep.mubr.bf16.mxu1 %v3964_v20  ;;  %v3783_v20 = vld [vmem:[%s4705_s1 + $0x1e8] ss:$12 sps:$4 sm:$0xff]  }
  0x7b   : > { %622 = vmatmul.mubr.bf16.gmra.mrb[40].mxu0 %v3725_v1  ;;  %3497 = vmatmul.mubr.bf16.gmra.mrb[40].mxu1 %v3984_v26  ;;  %v3768_v26 = vld [vmem:[%s4705_s1 + $0x1f8] ss:$12 sps:$4 sm:$0xff]  }
  0x7c   : > { %631 = vmatprep.mubr.bf16.mxu0 %v3842_v2  ;;  %3500 = vmatprep.mubr.bf16.mxu1 %v4000_v31  ;;  %v3773_v31 = vld [vmem:[%s4705_s1 + $0x210] ss:$12 sps:$4 sm:$0xff]  }
  0x83   : > { %632 = vmatmul.mubr.bf16.gmra.mrb[44].mxu0 %v3726_v3  ;;  %3501 = vmatmul.mubr.bf16.gmra.mrb[44].mxu1 %v4019_v37  ;;  %v3767_v37 = vld [vmem:[%s3925_s11 + $0x68] sm:$0xff]  }
  0x84   : > { %1396 = vmatprep.mubr.bf16.mxu1 %v3842_v2  ;;  %3520 = vmatprep.mubr.bf16.mxu0 %v3738_v4 }
  0x8b   : > { %1397 = vmatmul.mubr.bf16.vlgmr.msra.gmra.mrb[48].mxu1 %v3738_v4  ;;  %3521 = vmatmul.mubr.bf16.vlgmr.msra.gmra.mrb[48].mxu0 %v3739_v5 }
  0x8c   : > { %2300 = vmatpush1.bf16.msra.mxu0 %v3740_v6  ;;  %3553 = vmatpush3.bf16.msra.mxu1 %v3743_v63 }
  0x8d   : > { %1406 = vmatprep.mubr.bf16.mxu1 %v3842_v2  ;;  %3524 = vmatprep.mubr.bf16.mxu0 %v3744_v7 }
  0x8e   : > { %2301 = vmatprep.subr.bf16.mxu0 %v3748_v8  ;;  %3554 = vmatprep.subr.bf16.mxu1 %v3754_v9 }
  0x90   : > { %2302 = vmatpush1.bf16.msra.mxu0 %v3746_v10  ;;  %3555 = vmatpush3.bf16.msra.mxu1 %v3754_v9  ;;  %v4254_v9 = vld [vmem:[%s3925_s11 + $0x60] sm:$0xff]  }
  0x91   : > { %2303 = vmatprep.subr.bf16.mxu0 %v3753_v11  ;;  %3556 = vmatprep.subr.bf16.mxu1 %v3765_v12 }
  0x93   : > { %1407 = vmatmul.mubr.bf16.gmra.mrb[52].mxu1 %v3739_v5  ;;  %3525 = vmatmul.mubr.bf16.gmra.mrb[52].mxu0 %v3745_v13 }
  0x94   : > { %1416 = vmatprep.mubr.bf16.mxu1 %v3842_v2  ;;  %3528 = vmatprep.mubr.bf16.mxu0 %v3749_v14 }
  0x95   : > { %2304 = vmatpush1.bf16.msra.mxu0 %v3751_v15  ;;  %3557 = vmatpush3.bf16.msra.mxu1 %v3765_v12 }
  0x96   : > { %2305 = vmatprep.subr.bf16.mxu0 %v3759_v16  ;;  %3558 = vmatprep.subr.bf16.mxu1 %v3776_v17 }
  0x99   : > { %2306 = vmatpush1.bf16.msra.mxu0 %v3757_v18  ;;  %3559 = vmatpush3.bf16.msra.mxu1 %v3776_v17 }
  0x9a   : > { %2307 = vmatprep.subr.bf16.mxu0 %v3764_v19  ;;  %3560 = vmatprep.subr.bf16.mxu1 %v3783_v20 }
  0x9b   : > { %1417 = vmatmul.mubr.bf16.gmra.mrb[56].mxu1 %v3744_v7  ;;  %3529 = vmatmul.mubr.bf16.gmra.mrb[56].mxu0 %v3750_v21 }
  0x9c   : > { %1426 = vmatprep.mubr.bf16.mxu1 %v3842_v2  ;;  %3532 = vmatprep.mubr.bf16.mxu0 %v3755_v22 }
  0x9d   : > { %2308 = vmatpush1.bf16.msra.mxu0 %v3762_v23  ;;  %3561 = vmatpush3.bf16.msra.mxu1 %v3783_v20 }
  0x9e   : > { %2309 = vmatprep.subr.bf16.mxu0 %v3770_v24  ;;  %3562 = vmatprep.subr.bf16.mxu1 %v3786_v25  ;;  %v4269_v24 = vld [vmem:[%s3925_s11 + $0x68] sm:$0xff]  }
  0xa1   : > { %2310 = vmatpush1.bf16.msra.mxu0 %v3768_v26  ;;  %3563 = vmatpush3.bf16.msra.mxu1 %v3786_v25 }
  0xa2   : > { %2311 = vmatprep.subr.bf16.mxu0 %v3775_v27  ;;  %3564 = vmatprep.subr.bf16.mxu1 %v3789_v28 }
  0xa3   : > { %1427 = vmatmul.mubr.bf16.gmra.mrb[60].mxu1 %v3745_v13  ;;  %3533 = vmatmul.mubr.bf16.gmra.mrb[60].mxu0 %v3756_v29 }
  0xa4   : > { %1436 = vmatprep.mubr.bf16.mxu1 %v3842_v2  ;;  %3536 = vmatprep.mubr.bf16.mxu0 %v3760_v30 }
  0xa5   : > { %2312 = vmatpush1.bf16.msra.mxu0 %v3773_v31  ;;  %3565 = vmatpush3.bf16.msra.mxu1 %v3789_v28 }
  0xa6   : > { %2313 = vmatprep.subr.bf16.mxu0 %v3781_v32  ;;  %3566 = vmatprep.subr.bf16.mxu1 %v3792_v33 }
  0xa9   : > { %2314 = vmatpush1.bf16.msra.mxu0 %v3779_v34  ;;  %3567 = vmatpush3.bf16.msra.mxu1 %v3792_v33 }
  0xab   : > { %1437 = vmatmul.mubr.bf16.gmra.mrb[64].mxu1 %v3749_v14  ;;  %3537 = vmatmul.mubr.bf16.gmra.mrb[64].mxu0 %v3761_v35 }
  0xac   : > { %1446 = vmatprep.mubr.bf16.mxu1 %v3842_v2  ;;  %3540 = vmatprep.mubr.bf16.mxu0 %v3766_v36 }
  0xb3   : > { %1447 = vmatmul.mubr.bf16.gmra.mrb[68].mxu1 %v3750_v21  ;;  %3541 = vmatmul.mubr.bf16.gmra.mrb[68].mxu0 %v3767_v37 }
  0xb4   : > { %1456 = vmatprep.mubr.bf16.mxu1 %v3842_v2  ;;  %3544 = vmatprep.mubr.bf16.mxu0 %v3771_v38 }
  0xbb   : > { %1457 = vmatmul.mubr.bf16.gmra.mrb[72].mxu1 %v3755_v22  ;;  %3545 = vmatmul.mubr.bf16.gmra.mrb[72].mxu0 %v3772_v39 }
  0xbc   : > { %1466 = vmatprep.mubr.bf16.mxu1 %v3842_v2  ;;  %3548 = vmatprep.mubr.bf16.mxu0 %v3777_v40 }
  0xc3   : > { %1467 = vmatmul.mubr.bf16.gmra.mrb[76].mxu1 %v3756_v29  ;;  %3549 = vmatmul.mubr.bf16.gmra.mrb[76].mxu0 %v3778_v41 }
  0xc4   : > { %1476 = vmatprep.mubr.bf16.mxu1 %v3842_v2  ;;  %2331 = vmatprep.mubr.bf16.mxu0 %v3842_v2 }
  0xcb   : > { %1477 = vmatmul.mubr.bf16.gmra.mrb[80].mxu1 %v3760_v30  ;;  %2332 = vmatmul.mubr.bf16.vlgmr.msra.gmra.mrb[80].mxu0 %v3782_v42 }
  0xcc   : > { %1486 = vmatprep.mubr.bf16.mxu1 %v3842_v2  ;;  %2341 = vmatprep.mubr.bf16.mxu0 %v3842_v2 }
  0xd3   : > { %1487 = vmatmul.mubr.bf16.gmra.mrb[84].mxu1 %v3761_v35  ;;  %2342 = vmatmul.mubr.bf16.gmra.mrb[84].mxu0 %v4202_v43 }
  0xd4   : > { %1496 = vmatprep.mubr.bf16.mxu1 %v3842_v2  ;;  %2351 = vmatprep.mubr.bf16.mxu0 %v3842_v2 }
  0xdb   : > { %1497 = vmatmul.mubr.bf16.gmra.mrb[88].mxu1 %v3766_v36  ;;  %2352 = vmatmul.mubr.bf16.gmra.mrb[88].mxu0 %v4208_v44 }
  0xdc   : > { %1506 = vmatprep.mubr.bf16.mxu1 %v3842_v2  ;;  %2361 = vmatprep.mubr.bf16.mxu0 %v3842_v2 }
  0xe3   : > { %1507 = vmatmul.mubr.bf16.gmra.mrb[92].mxu1 %v3767_v37  ;;  %2362 = vmatmul.mubr.bf16.gmra.mrb[92].mxu0 %v4214_v45 }
  0xe4   : > { %1516 = vmatprep.mubr.bf16.mxu1 %v3842_v2  ;;  %2371 = vmatprep.mubr.bf16.mxu0 %v3842_v2 }
  0xeb   : > { %1517 = vmatmul.mubr.bf16.gmra.mrb[96].mxu1 %v3771_v38  ;;  %2372 = vmatmul.mubr.bf16.gmra.mrb[96].mxu0 %v4220_v46 }
  0xec   : > { %1526 = vmatprep.mubr.bf16.mxu1 %v3842_v2  ;;  %2381 = vmatprep.mubr.bf16.mxu0 %v3842_v2 }
  0xf3   : > { %1527 = vmatmul.mubr.bf16.gmra.mrb[100].mxu1 %v3772_v39  ;;  %2382 = vmatmul.mubr.bf16.gmra.mrb[100].mxu0 %v4226_v47 }
  0xf4   : > { %1536 = vmatprep.mubr.bf16.mxu1 %v3842_v2  ;;  %2391 = vmatprep.mubr.bf16.mxu0 %v3842_v2 }
  0xfb   : > { %1537 = vmatmul.mubr.bf16.gmra.mrb[104].mxu1 %v3777_v40  ;;  %2392 = vmatmul.mubr.bf16.gmra.mrb[104].mxu0 %v4232_v48 }
  0xfc   : > { %1546 = vmatprep.mubr.bf16.mxu1 %v3842_v2  ;;  %2401 = vmatprep.mubr.bf16.mxu0 %v3842_v2 }
  0xfe   : > { %v523_v51 = vpop.f32.mrb[0].mxu0  ;;  %v643_v52 = vpop.f32.mrb[0].mxu1 }
  0xff   : > { %v525_v53 = vpop.f32.mrb[1].mxu0  ;;  %v645_v54 = vpop.f32.mrb[1].mxu1 }
 0x100   : > { %v527_v56 = vpop.f32.mrb[2].mxu0  ;;  %v647_v57 = vpop.f32.mrb[2].mxu1  ;;  %v843_v60 = vrot.slane %v525_v53, 1  ;;  %v867_v61 = vrot.slane %v645_v54, 1 }
 0x101   : > { %v529_v58 = vpop.f32.mrb[3].mxu0  ;;  %v649_v59 = vpop.f32.mrb[3].mxu1 }
 0x102   : > { %v844_v62 = vrot.slane %v529_v58, 1  ;;  %v868_v63 = vrot.slane %v649_v59, 1 }
 0x103   : > { %1547 = vmatmul.mubr.bf16.gmra.mrb[108].mxu1 %v3778_v41  ;;  %2402 = vmatmul.mubr.bf16.gmra.mrb[108].mxu0 %v4240_v55  ;;  %v3796_v41 = vld [vmem:[%s3925_s11 + $0x70] sm:$0xff]  }
 0x104   : > { %v908_v0 = vsel %vm877_vm0, %v843_v60, %v844_v62  ;;  %v884_v1 = vsel %vm877_vm0, %v867_v61, %v868_v63  ;;  %2411 = vmatprep.mubr.bf16.mxu0 %v3842_v2  ;;  %3568 = vmatprep.mubr.bf16.mxu1 %v3782_v42  ;;  %v3797_v60 = vld [vmem:[%s3925_s11 + $0x78] sm:$0xff]  }
 0x105   : > { %v4249_v3 = vadd.f32 %v908_v0, %v523_v51  ;;  %v4251_v4 = vadd.f32 %v884_v1, %v643_v52 }
 0x106   : > { %v533_v5 = vpop.f32.mrb[4].mxu0  ;;  %v653_v6 = vpop.f32.mrb[4].mxu1 }
 0x107   : > { %v535_v7 = vpop.f32.mrb[5].mxu0  ;;  %v655_v8 = vpop.f32.mrb[5].mxu1 }
 0x108   : > { %v845_v10 = vrot.slane %v535_v7, 1  ;;  %v869_v11 = vrot.slane %v655_v8, 1  ;;  %v537_v12 = vpop.f32.mrb[6].mxu0  ;;  %v657_v13 = vpop.f32.mrb[6].mxu1 }
 0x109   : > { %v539_v14 = vpop.f32.mrb[7].mxu0  ;;  %v659_v15 = vpop.f32.mrb[7].mxu1 }
 0x10a   : > { %v907_v16 = vsel %vm877_vm0, %v844_v62, %v845_v10  ;;  %v883_v17 = vsel %vm877_vm0, %v868_v63, %v869_v11 }
 0x10b   : > { %v4260_v18 = vadd.f32 %v907_v16, %v527_v56  ;;  %v4262_v19 = vadd.f32 %v883_v17, %v647_v57  ;;  %2412 = vmatmul.mubr.bf16.gmra.mrb[112].mxu0 %v4254_v9  ;;  %3569 = vmatmul.mubr.bf16.vlgmr.msra.gmra.mrb[112].mxu1 %v4202_v43  ;;  %v3798_v17 = vld [vmem:[%s3925_s11 + $0x80] sm:$0xff]  }
 0x10c   : > { %2421 = vmatprep.mubr.bf16.mxu0 %v3842_v2  ;;  %3572 = vmatprep.mubr.bf16.mxu1 %v4208_v44 }
 0x10e   : > { %v543_v20 = vpop.f32.mrb[8].mxu0  ;;  %v663_v21 = vpop.f32.mrb[8].mxu1 }
 0x10f   : > { %v545_v22 = vpop.f32.mrb[9].mxu0  ;;  %v665_v23 = vpop.f32.mrb[9].mxu1 }
 0x110   : > { %v547_v25 = vpop.f32.mrb[10].mxu0  ;;  %v667_v26 = vpop.f32.mrb[10].mxu1  ;;  %v847_v29 = vrot.slane %v545_v22, 1  ;;  %v871_v30 = vrot.slane %v665_v23, 1 }
 0x111   : > { %v549_v27 = vpop.f32.mrb[11].mxu0  ;;  %v669_v28 = vpop.f32.mrb[11].mxu1 }
 0x112   : > { %v848_v31 = vrot.slane %v549_v27, 1  ;;  %v872_v32 = vrot.slane %v669_v28, 1 }
 0x113   : > { %2422 = vmatmul.mubr.bf16.gmra.mrb[116].mxu0 %v4269_v24  ;;  %3573 = vmatmul.mubr.bf16.gmra.mrb[116].mxu1 %v4214_v45 }
 0x114   : > { %v904_v33 = vsel %vm877_vm0, %v847_v29, %v848_v31  ;;  %v880_v34 = vsel %vm877_vm0, %v871_v30, %v872_v32  ;;  %2431 = vmatprep.mubr.bf16.mxu0 %v3842_v2  ;;  %3576 = vmatprep.mubr.bf16.mxu1 %v4220_v46 }
 0x115   : > { %v4279_v35 = vadd.f32 %v904_v33, %v543_v20  ;;  %v4281_v36 = vadd.f32 %v880_v34, %v663_v21 }
 0x116   : > { %v553_v37 = vpop.f32.mrb[12].mxu0  ;;  %v673_v38 = vpop.f32.mrb[12].mxu1 }
 0x117   : > { %v555_v39 = vpop.f32.mrb[13].mxu0  ;;  %v675_v40 = vpop.f32.mrb[13].mxu1  ;;  %v3799_v38 = vld [vmem:[%s3925_s11 + $0x88] sm:$0xff]  }
 0x118   : > { %v849_v42 = vrot.slane %v555_v39, 1  ;;  %v873_v43 = vrot.slane %v675_v40, 1  ;;  %v557_v44 = vpop.f32.mrb[14].mxu0  ;;  %v677_v45 = vpop.f32.mrb[14].mxu1 }
 0x119   : > { %v559_v49 = vpop.f32.mrb[15].mxu0  ;;  %v679_v51 = vpop.f32.mrb[15].mxu1 }
 0x11a   : > { %v903_v52 = vsel %vm877_vm0, %v848_v31, %v849_v42  ;;  %v879_v46 = vsel %vm877_vm0, %v872_v32, %v873_v43 }
 0x11b   : > { %v915_v53 = vadd.f32 %v903_v52, %v547_v25  ;;  %v4288_v54 = vadd.f32 %v879_v46, %v667_v26  ;;  %2432 = vmatmul.mubr.bf16.gmra.mrb[120].mxu0 %v3796_v41  ;;  %3577 = vmatmul.mubr.bf16.gmra.mrb[120].mxu1 %v4226_v47 }
 0x11c   : > { %2441 = vmatprep.mubr.bf16.mxu0 %v3842_v2  ;;  %3580 = vmatprep.mubr.bf16.mxu1 %v4232_v48 }
 0x11e   : > { %v563_v56 = vpop.f32.mrb[16].mxu0  ;;  %v3474_v57 = vpop.f32.mrb[16].mxu1 }
 0x11f   : > { %v565_v58 = vpop.f32.mrb[17].mxu0  ;;  %v716_v59 = vpop.f32.mrb[17].mxu1  ;;  %v944_v63 = vrot.slane %v3474_v57, 2 }
 0x120   : > { %v567_v61 = vpop.f32.mrb[18].mxu0  ;;  %v3475_v62 = vpop.f32.mrb[18].mxu1  ;;  %v851_v5 = vrot.slane %v565_v58, 1  ;;  %v942_v6 = vrot.slane %v716_v59, 2 }
 0x121   : > { %v569_v0 = vpop.f32.mrb[19].mxu0  ;;  %v719_v1 = vpop.f32.mrb[19].mxu1 }
 0x122   : > { %v852_v7 = vrot.slane %v569_v0, 1  ;;  %v943_v47 = vrot.slane %v719_v1, 2 }
 0x123   : > { %2442 = vmatmul.mubr.bf16.gmra.mrb[124].mxu0 %v3797_v60  ;;  %3581 = vmatmul.mubr.bf16.gmra.mrb[124].mxu1 %v4240_v55 }
 0x124   : > { %v900_v48 = vsel %vm877_vm0, %v851_v5, %v852_v7  ;;  %v1004_v8 = vsel %vm974_vm1, %v943_v47, %v944_v63  ;;  %v1005_v10 = vsel %vm974_vm1, %v942_v6, %v943_v47  ;;  %2451 = vmatprep.mubr.bf16.mxu0 %v3842_v2  ;;  %3584 = vmatprep.mubr.bf16.mxu1 %v4254_v9 }
 0x125   : > { %v918_v11 = vadd.f32 %v900_v48, %v563_v56  ;;  %v4305_v12 = vadd.f32 %v1005_v10, %v4249_v3  ;;  %v4308_v13 = vadd.f32 %v1004_v8, %v4260_v18 }
 0x126   : > { %v573_v55 = vpop.f32.mrb[20].mxu0  ;;  %v3478_v14 = vpop.f32.mrb[20].mxu1 }
 0x127   : > { %v575_v15 = vpop.f32.mrb[21].mxu0  ;;  %v732_v16 = vpop.f32.mrb[21].mxu1  ;;  %v948_v26 = vrot.slane %v3478_v14, 2 }
 0x128   : > { %v853_v20 = vrot.slane %v575_v15, 1  ;;  %v577_v21 = vpop.f32.mrb[22].mxu0  ;;  %v3479_v22 = vpop.f32.mrb[22].mxu1  ;;  %v946_v3 = vrot.slane %v732_v16, 2 }
 0x129   : > { %v579_v23 = vpop.f32.mrb[23].mxu0  ;;  %v735_v25 = vpop.f32.mrb[23].mxu1  ;;  %v3801_v21 = vld [vmem:[%s3925_s11 + $0x98] sm:$0xff]  }
 0x12a   : > { %v899_v9 = vsel %vm877_vm0, %v852_v7, %v853_v20  ;;  %v947_v27 = vrot.slane %v735_v25, 2 }
 0x12b   : > { %v919_v28 = vadd.f32 %v899_v9, %v567_v61  ;;  %2452 = vmatmul.mubr.bf16.gmra.mrb[128].mxu0 %v3798_v17  ;;  %3585 = vmatmul.mubr.bf16.gmra.mrb[128].mxu1 %v4269_v24  ;;  %v3800_v61 = vld [vmem:[%s3925_s11 + $0x90] sm:$0xff]   ;;  %s3118_s11 = sshll.u32 %s3824_s12, 3 }
 0x12c   : > { %v1000_v18 = vsel %vm974_vm1, %v947_v27, %v948_v26  ;;  %v1001_v29 = vsel %vm974_vm1, %v946_v3, %v947_v27  ;;  %2461 = vmatprep.mubr.bf16.mxu0 %v3842_v2  ;;  %3588 = vmatprep.mubr.bf16.mxu1 %v3796_v41  ;;  %p188_p6 = scmp.lt.s32.totalorder %s3118_s11, 15 }
 0x12d   : > { %v4320_v30 = vadd.f32 %v1001_v29, %v4279_v35  ;;  %v4322_v31 = vadd.f32 %v1000_v18, %v915_v53 }
 0x12e   : > { %v583_v32 = vpop.f32.mrb[24].mxu0  ;;  %v3482_v33 = vpop.f32.mrb[24].mxu1  ;;  %s4721_s11 = smov (!%p188_p6, %s3118_s11), 15 }
 0x12f   : > { %v585_v34 = vpop.f32.mrb[25].mxu0  ;;  %v748_v37 = vpop.f32.mrb[25].mxu1  ;;  %v952_v40 = vrot.slane %v3482_v33, 2  ;;  %s3119_s12 = sshll.u32 %s4721_s11, 1 }
 0x130   : > { %v587_v24 = vpop.f32.mrb[26].mxu0  ;;  %v3483_v39 = vpop.f32.mrb[26].mxu1  ;;  %v855_v44 = vrot.slane %v585_v34, 1  ;;  %v950_v45 = vrot.slane %v748_v37, 2  ;;  %s192_s9 = sadd.s32 %s3120_s8, %s3119_s12 }
 0x131   : > { %v589_v42 = vpop.f32.mrb[27].mxu0  ;;  %v751_v43 = vpop.f32.mrb[27].mxu1  ;;  %s3121_s19 = sshll.u32 %s192_s9, 3 }
 0x132   : > { %v856_v49 = vrot.slane %v589_v42, 1  ;;  %v951_v41 = vrot.slane %v751_v43, 2  ;;  %s4588_s22 = scalar_lea.vmem %s4707_s3, %s3121_s19 }
 0x133   : > { %2462 = vmatmul.mubr.bf16.gmra.mrb[132].mxu0 %v3799_v38  ;;  %3589 = vmatmul.mubr.bf16.gmra.mrb[132].mxu1 %v3797_v60 }
 0x134   : > { %v896_v35 = vsel %vm877_vm0, %v855_v44, %v856_v49  ;;  %v996_v51 = vsel %vm974_vm1, %v951_v41, %v952_v40  ;;  %v997_v52 = vsel %vm974_vm1, %v950_v45, %v951_v41  ;;  %2471 = vmatprep.mubr.bf16.mxu0 %v3842_v2  ;;  %3592 = vmatprep.mubr.bf16.mxu1 %v3798_v17 }
 0x135   : > { %v922_v46 = vadd.f32 %v896_v35, %v583_v32  ;;  %v4332_v53 = vadd.f32 %v997_v52, %v918_v11  ;;  %v4334_v56 = vadd.f32 %v996_v51, %v919_v28 }
 0x136   : > { %v593_v57 = vpop.f32.mrb[28].mxu0  ;;  %v3486_v58 = vpop.f32.mrb[28].mxu1 }
 0x137   : > { %v595_v59 = vpop.f32.mrb[29].mxu0  ;;  %v764_v60 = vpop.f32.mrb[29].mxu1  ;;  %v956_v6 = vrot.slane %v3486_v58, 2 }
 0x138   : > { %v857_v62 = vrot.slane %v595_v59, 1  ;;  %v597_v63 = vpop.f32.mrb[30].mxu0  ;;  %v3487_v0 = vpop.f32.mrb[30].mxu1  ;;  %v954_v47 = vrot.slane %v764_v60, 2 }
 0x139   : > { %v599_v1 = vpop.f32.mrb[31].mxu0  ;;  %v767_v5 = vpop.f32.mrb[31].mxu1 }
 0x13a   : > { %v895_v7 = vsel %vm877_vm0, %v856_v49, %v857_v62  ;;  %v955_v48 = vrot.slane %v767_v5, 2 }
 0x13b   : > { %v923_v8 = vadd.f32 %v895_v7, %v587_v24  ;;  %2472 = vmatmul.mubr.bf16.gmra.mrb[136].mxu0 %v3800_v61  ;;  %3593 = vmatmul.mubr.bf16.gmra.mrb[136].mxu1 %v3799_v38 }
 0x13c   : > { %v992_v10 = vsel %vm974_vm1, %v955_v48, %v956_v6  ;;  %v993_v11 = vsel %vm974_vm1, %v954_v47, %v955_v48  ;;  %2481 = vmatprep.mubr.bf16.mxu0 %v3842_v2  ;;  %3596 = vmatprep.mubr.bf16.mxu1 %v3800_v61 }
 0x13d   : > { %v4344_v55 = vadd.f32 %v993_v11, %v922_v46  ;;  %v4346_v14 = vadd.f32 %v992_v10, %v923_v8 }
 0x13e   : > { %v603_v15 = vpop.f32.mrb[32].mxu0  ;;  %v3490_v16 = vpop.f32.mrb[32].mxu1 }
 0x13f   : > { %v605_v17 = vpop.f32.mrb[33].mxu0  ;;  %v780_v20 = vpop.f32.mrb[33].mxu1  ;;  %v960_v25 = vrot.slane %v3490_v16, 2 }
 0x140   : > { %v607_v22 = vpop.f32.mrb[34].mxu0  ;;  %v3491_v23 = vpop.f32.mrb[34].mxu1  ;;  %v859_v3 = vrot.slane %v605_v17, 1  ;;  %v958_v27 = vrot.slane %v780_v20, 2 }
 0x141   : > { %v609_v26 = vpop.f32.mrb[35].mxu0  ;;  %v783_v9 = vpop.f32.mrb[35].mxu1 }
 0x142   : > { %v860_v28 = vrot.slane %v609_v26, 1  ;;  %v959_v18 = vrot.slane %v783_v9, 2 }
 0x143   : > { %2482 = vmatmul.mubr.bf16.gmra.mrb[140].mxu0 %v3801_v21  ;;  %3597 = vmatmul.mubr.bf16.gmra.mrb[140].mxu1 %v3801_v21 }
 0x144   : > { %v892_v2 = vsel %vm877_vm0, %v859_v3, %v860_v28  ;;  %v988_v29 = vsel %vm974_vm1, %v959_v18, %v960_v25  ;;  %v989_v32 = vsel %vm974_vm1, %v958_v27, %v959_v18 }
 0x145   : > { %v926_v33 = vadd.f32 %v892_v2, %v603_v15 }
 0x146   : > { %v613_v34 = vpop.f32.mrb[36].mxu0  ;;  %v3494_v37 = vpop.f32.mrb[36].mxu1 }
 0x147   : > { %v4355_v38 = vadd.f32 %v989_v32, %v926_v33  ;;  %v615_v24 = vpop.f32.mrb[37].mxu0  ;;  %v796_v39 = vpop.f32.mrb[37].mxu1  ;;  %v964_v49 = vrot.slane %v3494_v37, 2 }
 0x148   : > { %v861_v40 = vrot.slane %v615_v24, 1  ;;  %v617_v42 = vpop.f32.mrb[38].mxu0  ;;  %v3495_v43 = vpop.f32.mrb[38].mxu1  ;;  %v962_v35 = vrot.slane %v796_v39, 2 }
 0x149   : > { %v619_v44 = vpop.f32.mrb[39].mxu0  ;;  %v799_v45 = vpop.f32.mrb[39].mxu1 }
 0x14a   : > { %v891_v41 = vsel %vm877_vm0, %v860_v28, %v861_v40  ;;  %v963_v51 = vrot.slane %v799_v45, 2 }
 0x14b   : > { %v927_v52 = vadd.f32 %v891_v41, %v607_v22 }
 0x14c   : > { %v984_v46 = vsel %vm974_vm1, %v963_v51, %v964_v49  ;;  %v985_v57 = vsel %vm974_vm1, %v962_v35, %v963_v51 }
 0x14d   : > { %v4363_v58 = vadd.f32 %v988_v29, %v927_v52 }
 0x14e   : > { %v623_v59 = vpop.f32.mrb[40].mxu0  ;;  %v3498_v60 = vpop.f32.mrb[40].mxu1 }
 0x14f   : > { %v625_v61 = vpop.f32.mrb[41].mxu0  ;;  %v812_v62 = vpop.f32.mrb[41].mxu1  ;;  %v968_v1 = vrot.slane %v3498_v60, 2 }
 0x150   : > { %v627_v63 = vpop.f32.mrb[42].mxu0  ;;  %v3499_v0 = vpop.f32.mrb[42].mxu1  ;;  %v863_v7 = vrot.slane %v625_v61, 1  ;;  %v966_v47 = vrot.slane %v812_v62, 2 }
 0x151   : > { %v629_v5 = vpop.f32.mrb[43].mxu0  ;;  %v815_v6 = vpop.f32.mrb[43].mxu1 }
 0x152   : > { %v864_v48 = vrot.slane %v629_v5, 1  ;;  %v967_v8 = vrot.slane %v815_v6, 2 }
 0x154   : > { %v888_v10 = vsel %vm877_vm0, %v863_v7, %v864_v48  ;;  %v980_v11 = vsel %vm974_vm1, %v967_v8, %v968_v1  ;;  %v981_v15 = vsel %vm974_vm1, %v966_v47, %v967_v8 }
 0x155   : > { %v930_v16 = vadd.f32 %v888_v10, %v623_v59  ;;  %v4372_v17 = vadd.f32 %v981_v15, %v4251_v4  ;;  %v4375_v20 = vadd.f32 %v980_v11, %v4262_v19 }
 0x156   : > { %v633_v21 = vpop.f32.mrb[44].mxu0  ;;  %v3502_v22 = vpop.f32.mrb[44].mxu1 }
 0x157   : > { %v4377_v23 = vadd.f32 %v985_v57, %v930_v16  ;;  %v635_v25 = vpop.f32.mrb[45].mxu0  ;;  %v828_v26 = vpop.f32.mrb[45].mxu1  ;;  %v972_v2 = vrot.slane %v3502_v22, 2 }
 0x158   : > { %v865_v9 = vrot.slane %v635_v25, 1  ;;  %v637_v3 = vpop.f32.mrb[46].mxu0  ;;  %v3503_v27 = vpop.f32.mrb[46].mxu1  ;;  %v970_v4 = vrot.slane %v828_v26, 2 }
 0x159   : > { %v639_v28 = vpop.f32.mrb[47].mxu0  ;;  %v831_v18 = vpop.f32.mrb[47].mxu1 }
 0x15a   : > { %v887_v29 = vsel %vm877_vm0, %v864_v48, %v865_v9  ;;  %v971_v32 = vrot.slane %v831_v18, 2 }
 0x15b   : > { %v931_v33 = vadd.f32 %v887_v29, %v627_v63 }
 0x15c   : > { %v976_v19 = vsel %vm974_vm1, %v971_v32, %v972_v2  ;;  %v977_v34 = vsel %vm974_vm1, %v970_v4, %v971_v32 }
 0x15d   : > { %v4385_v37 = vadd.f32 %v984_v46, %v931_v33  ;;  %v4388_v24 = vadd.f32 %v977_v34, %v4281_v36  ;;  %v4391_v39 = vadd.f32 %v976_v19, %v4288_v54 }
 0x15e   : > { %v1398_v40 = vpop.f32.mrb[48].mxu1  ;;  %v3522_v42 = vpop.f32.mrb[48].mxu0 }
 0x15f   : > { %v1400_v43 = vpop.f32.mrb[49].mxu1  ;;  %v1591_v44 = vpop.f32.mrb[49].mxu0  ;;  %v1816_v41 = vrot.slane %v3522_v42, 2 }
 0x160   : > { %v1402_v45 = vpop.f32.mrb[50].mxu1  ;;  %v3523_v49 = vpop.f32.mrb[50].mxu0  ;;  %v1718_v52 = vrot.slane %v1400_v43, 1  ;;  %v1814_v57 = vrot.slane %v1591_v44, 2 }
 0x161   : > { %v1404_v35 = vpop.f32.mrb[51].mxu1  ;;  %v1594_v51 = vpop.f32.mrb[51].mxu0 }
 0x162   : > { %v1719_v59 = vrot.slane %v1404_v35, 1  ;;  %v1815_v46 = vrot.slane %v1594_v51, 2 }
 0x164   : > { %v1780_v36 = vsel %vm877_vm0, %v1718_v52, %v1719_v59  ;;  %v1875_v54 = vsel %vm974_vm1, %v1815_v46, %v1816_v41  ;;  %v1876_v60 = vsel %vm974_vm1, %v1814_v57, %v1815_v46 }
 0x165   : > { %v1782_v61 = vadd.f32 %v1780_v36, %v1398_v40 }
 0x166   : > { %v1408_v62 = vpop.f32.mrb[52].mxu1  ;;  %v3526_v63 = vpop.f32.mrb[52].mxu0 }
 0x167   : > { %v1878_v0 = vadd.f32 %v1876_v60, %v1782_v61  ;;  %v1410_v1 = vpop.f32.mrb[53].mxu1  ;;  %v1607_v5 = vpop.f32.mrb[53].mxu0  ;;  %v1820_v11 = vrot.slane %v3526_v63, 2 }
 0x168   : > { %v1720_v6 = vrot.slane %v1410_v1, 1  ;;  %v1412_v7 = vpop.f32.mrb[54].mxu1  ;;  %v3527_v47 = vpop.f32.mrb[54].mxu0  ;;  %v1818_v16 = vrot.slane %v1607_v5, 2 }
 0x169   : > { %v4400_v48 = vadd.f32 %v1878_v0, %v4305_v12  ;;  %v1414_v8 = vpop.f32.mrb[55].mxu1  ;;  %v1610_v10 = vpop.f32.mrb[55].mxu0 }
 0x16a   : > { %v1779_v15 = vsel %vm877_vm0, %v1719_v59, %v1720_v6  ;;  %v1819_v21 = vrot.slane %v1610_v10, 2 }
 0x16b   : > { %v1783_v22 = vadd.f32 %v1779_v15, %v1402_v45 }
 0x16c   : > { %v1871_v25 = vsel %vm974_vm1, %v1819_v21, %v1820_v11  ;;  %v1872_v26 = vsel %vm974_vm1, %v1818_v16, %v1819_v21 }
 0x16d   : > { %v1879_v9 = vadd.f32 %v1875_v54, %v1783_v22 }
 0x16e   : > { %v1418_v3 = vpop.f32.mrb[56].mxu1  ;;  %v3530_v27 = vpop.f32.mrb[56].mxu0 }
 0x16f   : > { %v1420_v12 = vpop.f32.mrb[57].mxu1  ;;  %v1623_v28 = vpop.f32.mrb[57].mxu0  ;;  %v4409_v18 = vadd.f32 %v1879_v9, %v4308_v13  ;;  %v1824_v4 = vrot.slane %v3530_v27, 2 }
 0x170   : > { %v1422_v2 = vpop.f32.mrb[58].mxu1  ;;  %v3531_v29 = vpop.f32.mrb[58].mxu0  ;;  %v1722_v19 = vrot.slane %v1420_v12, 1  ;;  %v1822_v34 = vrot.slane %v1623_v28, 2 }
 0x171   : > { %v1424_v32 = vpop.f32.mrb[59].mxu1  ;;  %v1626_v33 = vpop.f32.mrb[59].mxu0 }
 0x172   : > { %v1723_v40 = vrot.slane %v1424_v32, 1  ;;  %v1823_v42 = vrot.slane %v1626_v33, 2 }
 0x174   : > { %v1776_v43 = vsel %vm877_vm0, %v1722_v19, %v1723_v40  ;;  %v1867_v44 = vsel %vm974_vm1, %v1823_v42, %v1824_v4  ;;  %v1868_v45 = vsel %vm974_vm1, %v1822_v34, %v1823_v42 }
 0x175   : > { %v1786_v13 = vadd.f32 %v1776_v43, %v1418_v3 }
 0x176   : > { %v1428_v49 = vpop.f32.mrb[60].mxu1  ;;  %v3534_v41 = vpop.f32.mrb[60].mxu0 }
 0x177   : > { %v1882_v35 = vadd.f32 %v1872_v26, %v1786_v13  ;;  %v1430_v51 = vpop.f32.mrb[61].mxu1  ;;  %v1639_v52 = vpop.f32.mrb[61].mxu0  ;;  %v1828_v61 = vrot.slane %v3534_v41, 2 }
 0x178   : > { %v1724_v57 = vrot.slane %v1430_v51, 1  ;;  %v1432_v59 = vpop.f32.mrb[62].mxu1  ;;  %v3535_v46 = vpop.f32.mrb[62].mxu0  ;;  %v1826_v63 = vrot.slane %v1639_v52, 2 }
 0x179   : > { %v1434_v36 = vpop.f32.mrb[63].mxu1  ;;  %v1642_v54 = vpop.f32.mrb[63].mxu0  ;;  %v4418_v60 = vadd.f32 %v1882_v35, %v4320_v30 }
 0x17a   : > { %v1775_v62 = vsel %vm877_vm0, %v1723_v40, %v1724_v57  ;;  %v1827_v0 = vrot.slane %v1642_v54, 2 }
 0x17b   : > { %v1787_v1 = vadd.f32 %v1775_v62, %v1422_v2 }
 0x17c   : > { %v4424_v5 = vsel %vm974_vm1, %v1827_v0, %v1828_v61  ;;  %v1864_v6 = vsel %vm974_vm1, %v1826_v63, %v1827_v0 }
 0x17d   : > { %v1883_v7 = vadd.f32 %v1871_v25, %v1787_v1 }
 0x17e   : > { %v1438_v47 = vpop.f32.mrb[64].mxu1  ;;  %v3538_v8 = vpop.f32.mrb[64].mxu0 }
 0x17f   : > { %v1440_v10 = vpop.f32.mrb[65].mxu1  ;;  %v1655_v30 = vpop.f32.mrb[65].mxu0  ;;  %v4429_v11 = vadd.f32 %v1883_v7, %v4322_v31  ;;  %v1832_v21 = vrot.slane %v3538_v8, 2 }
 0x180   : > { %v1442_v15 = vpop.f32.mrb[66].mxu1  ;;  %v3539_v16 = vpop.f32.mrb[66].mxu0  ;;  %v1726_v9 = vrot.slane %v1440_v10, 1  ;;  %v1830_v3 = vrot.slane %v1655_v30, 2 }
 0x181   : > { %v1444_v22 = vpop.f32.mrb[67].mxu1  ;;  %v1658_v26 = vpop.f32.mrb[67].mxu0 }
 0x182   : > { %v1727_v27 = vrot.slane %v1444_v22, 1  ;;  %v1831_v12 = vrot.slane %v1658_v26, 2 }
 0x184   : > { %v1772_v28 = vsel %vm877_vm0, %v1726_v9, %v1727_v27  ;;  %v4435_v25 = vsel %vm974_vm1, %v1831_v12, %v1832_v21  ;;  %v4439_v31 = vsel %vm974_vm1, %v1830_v3, %v1831_v12 }
 0x185   : > { %v1790_v2 = vadd.f32 %v1772_v28, %v1438_v47 }
 0x186   : > { %v1448_v29 = vpop.f32.mrb[68].mxu1  ;;  %v3542_v4 = vpop.f32.mrb[68].mxu0 }
 0x187   : > { %v1886_v32 = vadd.f32 %v1868_v45, %v1790_v2  ;;  %v1450_v33 = vpop.f32.mrb[69].mxu1  ;;  %v1671_v19 = vpop.f32.mrb[69].mxu0  ;;  %v1836_v41 = vrot.slane %v3542_v4, 2 }
 0x188   : > { %v1728_v34 = vrot.slane %v1450_v33, 1  ;;  %v1452_v40 = vpop.f32.mrb[70].mxu1  ;;  %v3543_v42 = vpop.f32.mrb[70].mxu0  ;;  %v1834_v51 = vrot.slane %v1671_v19, 2 }
 0x189   : > { %v1454_v43 = vpop.f32.mrb[71].mxu1  ;;  %v1674_v13 = vpop.f32.mrb[71].mxu0  ;;  %v4442_v49 = vadd.f32 %v1886_v32, %v4332_v53 }
 0x18a   : > { %v1771_v35 = vsel %vm877_vm0, %v1727_v27, %v1728_v34  ;;  %v1835_v52 = vrot.slane %v1674_v13, 2 }
 0x18b   : > { %v1791_v57 = vadd.f32 %v1771_v35, %v1442_v15 }
 0x18c   : > { %v4448_v45 = vsel %vm974_vm1, %v1835_v52, %v1836_v41  ;;  %v4452_v59 = vsel %vm974_vm1, %v1834_v51, %v1835_v52 }
 0x18d   : > { %v1887_v46 = vadd.f32 %v1867_v44, %v1791_v57 }
 0x18e   : > { %v1458_v36 = vpop.f32.mrb[72].mxu1  ;;  %v3546_v54 = vpop.f32.mrb[72].mxu0 }
 0x18f   : > { %v1460_v53 = vpop.f32.mrb[73].mxu1  ;;  %v1687_v61 = vpop.f32.mrb[73].mxu0  ;;  %v4455_v62 = vadd.f32 %v1887_v46, %v4334_v56  ;;  %v1840_v1 = vrot.slane %v3546_v54, 2 }
 0x190   : > { %v1462_v63 = vpop.f32.mrb[74].mxu1  ;;  %v3547_v0 = vpop.f32.mrb[74].mxu0  ;;  %v1730_v8 = vrot.slane %v1460_v53, 1  ;;  %v1838_v10 = vrot.slane %v1687_v61, 2 }
 0x191   : > { %v1464_v7 = vpop.f32.mrb[75].mxu1  ;;  %v1690_v47 = vpop.f32.mrb[75].mxu0 }
 0x192   : > { %v1731_v30 = vrot.slane %v1464_v7, 1  ;;  %v1839_v15 = vrot.slane %v1690_v47, 2 }
 0x194   : > { %v1768_v16 = vsel %vm877_vm0, %v1730_v8, %v1731_v30  ;;  %v4461_v44 = vsel %vm974_vm1, %v1839_v15, %v1840_v1  ;;  %v4465_v56 = vsel %vm974_vm1, %v1838_v10, %v1839_v15 }
 0x195   : > { %v1794_v21 = vadd.f32 %v1768_v16, %v1458_v36 }
 0x196   : > { %v1468_v22 = vpop.f32.mrb[76].mxu1  ;;  %v3550_v26 = vpop.f32.mrb[76].mxu0 }
 0x197   : > { %v1890_v9 = vadd.f32 %v1864_v6, %v1794_v21  ;;  %v1470_v3 = vpop.f32.mrb[77].mxu1  ;;  %v1703_v27 = vpop.f32.mrb[77].mxu0  ;;  %v1844_v33 = vrot.slane %v3550_v26, 2 }
 0x198   : > { %v1732_v12 = vrot.slane %v1470_v3, 1  ;;  %v1472_v28 = vpop.f32.mrb[78].mxu1  ;;  %v3551_v2 = vpop.f32.mrb[78].mxu0  ;;  %v1842_v34 = vrot.slane %v1703_v27, 2 }
 0x199   : > { %v1474_v29 = vpop.f32.mrb[79].mxu1  ;;  %v1706_v4 = vpop.f32.mrb[79].mxu0  ;;  %v4468_v32 = vadd.f32 %v1890_v9, %v4344_v55 }
 0x19a   : > { %v1767_v19 = vsel %vm877_vm0, %v1731_v30, %v1732_v12  ;;  %v1843_v40 = vrot.slane %v1706_v4, 2 }
 0x19b   : > { %v1795_v42 = vadd.f32 %v1767_v19, %v1462_v63 }
 0x19c   : > { %v4474_v6 = vsel %vm974_vm1, %v1843_v40, %v1844_v33  ;;  %v4478_v43 = vsel %vm974_vm1, %v1842_v34, %v1843_v40 }
 0x19d   : > { %v1891_v13 = vadd.f32 %v4424_v5, %v1795_v42 }
 0x19e   : > { %v1478_v41 = vpop.f32.mrb[80].mxu1  ;;  %v2333_v55 = vpop.f32.mrb[80].mxu0 }
 0x19f   : > { %v1480_v35 = vpop.f32.mrb[81].mxu1  ;;  %v2335_v51 = vpop.f32.mrb[81].mxu0  ;;  %v4482_v52 = vadd.f32 %v1891_v13, %v4346_v14 }
 0x1a0   : > { %v1482_v57 = vpop.f32.mrb[82].mxu1  ;;  %v2337_v46 = vpop.f32.mrb[82].mxu0  ;;  %v1734_v53 = vrot.slane %v1480_v35, 1  ;;  %v2653_v61 = vrot.slane %v2335_v51, 1 }
 0x1a1   : > { %v1484_v36 = vpop.f32.mrb[83].mxu1  ;;  %v2339_v54 = vpop.f32.mrb[83].mxu0 }
 0x1a2   : > { %v1735_v63 = vrot.slane %v1484_v36, 1  ;;  %v2654_v0 = vrot.slane %v2339_v54, 1 }
 0x1a4   : > { %v1764_v1 = vsel %vm877_vm0, %v1734_v53, %v1735_v63  ;;  %v2715_v5 = vsel %vm877_vm0, %v2653_v61, %v2654_v0 }
 0x1a5   : > { %v1798_v7 = vadd.f32 %v1764_v1, %v1478_v41  ;;  %v4488_v47 = vadd.f32 %v2715_v5, %v2333_v55 }
 0x1a6   : > { %v1488_v8 = vpop.f32.mrb[84].mxu1  ;;  %v2343_v14 = vpop.f32.mrb[84].mxu0 }
 0x1a7   : > { %v1894_v10 = vadd.f32 %v4439_v31, %v1798_v7  ;;  %v1490_v30 = vpop.f32.mrb[85].mxu1  ;;  %v2345_v15 = vpop.f32.mrb[85].mxu0 }
 0x1a8   : > { %v1736_v16 = vrot.slane %v1490_v30, 1  ;;  %v2655_v21 = vrot.slane %v2345_v15, 1  ;;  %v1492_v22 = vpop.f32.mrb[86].mxu1  ;;  %v2347_v26 = vpop.f32.mrb[86].mxu0 }
 0x1a9   : > { %v1494_v9 = vpop.f32.mrb[87].mxu1  ;;  %v2349_v3 = vpop.f32.mrb[87].mxu0  ;;  %v4492_v27 = vadd.f32 %v1894_v10, %v4355_v38 }
 0x1aa   : > { %v1763_v12 = vsel %vm877_vm0, %v1735_v63, %v1736_v16  ;;  %v2714_v28 = vsel %vm877_vm0, %v2654_v0, %v2655_v21 }
 0x1ab   : > { %v1799_v2 = vadd.f32 %v1763_v12, %v1482_v57  ;;  %v4498_v29 = vadd.f32 %v2714_v28, %v2337_v46 }
 0x1ad   : > { %v1895_v31 = vadd.f32 %v4435_v25, %v1799_v2 }
 0x1ae   : > { %v1498_v4 = vpop.f32.mrb[88].mxu1  ;;  %v2353_v33 = vpop.f32.mrb[88].mxu0 }
 0x1af   : > { %v1500_v19 = vpop.f32.mrb[89].mxu1  ;;  %v2355_v34 = vpop.f32.mrb[89].mxu0  ;;  %v4502_v40 = vadd.f32 %v1895_v31, %v4363_v58 }
 0x1b0   : > { %v1502_v38 = vpop.f32.mrb[90].mxu1  ;;  %v2357_v42 = vpop.f32.mrb[90].mxu0  ;;  %v1738_v55 = vrot.slane %v1500_v19, 1  ;;  %v2657_v35 = vrot.slane %v2355_v34, 1 }
 0x1b1   : > { %v1504_v13 = vpop.f32.mrb[91].mxu1  ;;  %v2359_v41 = vpop.f32.mrb[91].mxu0 }
 0x1b2   : > { %v1739_v51 = vrot.slane %v1504_v13, 1  ;;  %v2658_v36 = vrot.slane %v2359_v41, 1 }
 0x1b4   : > { %v1760_v57 = vsel %vm877_vm0, %v1738_v55, %v1739_v51  ;;  %v2711_v25 = vsel %vm877_vm0, %v2657_v35, %v2658_v36 }
 0x1b5   : > { %v1802_v46 = vadd.f32 %v1760_v57, %v1498_v4  ;;  %v4508_v54 = vadd.f32 %v2711_v25, %v2353_v33 }
 0x1b6   : > { %v1508_v53 = vpop.f32.mrb[92].mxu1  ;;  %v2363_v58 = vpop.f32.mrb[92].mxu0 }
 0x1b7   : > { %v1898_v61 = vadd.f32 %v4452_v59, %v1802_v46  ;;  %v1510_v63 = vpop.f32.mrb[93].mxu1  ;;  %v2365_v0 = vpop.f32.mrb[93].mxu0 }
 0x1b8   : > { %v1740_v1 = vrot.slane %v1510_v63, 1  ;;  %v2659_v5 = vrot.slane %v2365_v0, 1  ;;  %v1512_v7 = vpop.f32.mrb[94].mxu1  ;;  %v2367_v8 = vpop.f32.mrb[94].mxu0 }
 0x1b9   : > { %v1514_v14 = vpop.f32.mrb[95].mxu1  ;;  %v2369_v10 = vpop.f32.mrb[95].mxu0  ;;  %v4512_v30 = vadd.f32 %v1898_v61, %v4377_v23 }
 0x1ba   : > { %v1759_v15 = vsel %vm877_vm0, %v1739_v51, %v1740_v1  ;;  %v2710_v16 = vsel %vm877_vm0, %v2658_v36, %v2659_v5 }
 0x1bb   : > { %v1803_v21 = vadd.f32 %v1759_v15, %v1502_v38  ;;  %v4518_v22 = vadd.f32 %v2710_v16, %v2357_v42 }
 0x1bd   : > { %v1899_v59 = vadd.f32 %v4448_v45, %v1803_v21 }
 0x1be   : > { %v1518_v26 = vpop.f32.mrb[96].mxu1  ;;  %v2373_v9 = vpop.f32.mrb[96].mxu0 }
 0x1bf   : > { %v1520_v3 = vpop.f32.mrb[97].mxu1  ;;  %v2375_v12 = vpop.f32.mrb[97].mxu0  ;;  %v4522_v28 = vadd.f32 %v1899_v59, %v4385_v37 }
 0x1c0   : > { %v1522_v23 = vpop.f32.mrb[98].mxu1  ;;  %v2377_v2 = vpop.f32.mrb[98].mxu0  ;;  %v1742_v33 = vrot.slane %v1520_v3, 1  ;;  %v2661_v19 = vrot.slane %v2375_v12, 1 }
 0x1c1   : > { %v1524_v31 = vpop.f32.mrb[99].mxu1  ;;  %v2379_v4 = vpop.f32.mrb[99].mxu0 }
 0x1c2   : > { %v1743_v34 = vrot.slane %v1524_v31, 1  ;;  %v2662_v13 = vrot.slane %v2379_v4, 1 }
 0x1c4   : > { %v1756_v38 = vsel %vm877_vm0, %v1742_v33, %v1743_v34  ;;  %v2707_v45 = vsel %vm877_vm0, %v2661_v19, %v2662_v13 }
 0x1c5   : > { %v1806_v42 = vadd.f32 %v1756_v38, %v1518_v26  ;;  %v4528_v41 = vadd.f32 %v2707_v45, %v2373_v9 }
 0x1c6   : > { %v1528_v55 = vpop.f32.mrb[100].mxu1  ;;  %v2383_v37 = vpop.f32.mrb[100].mxu0 }
 0x1c7   : > { %v1902_v35 = vadd.f32 %v4465_v56, %v1806_v42  ;;  %v1530_v51 = vpop.f32.mrb[101].mxu1  ;;  %v2385_v36 = vpop.f32.mrb[101].mxu0 }
 0x1c8   : > { %v1744_v57 = vrot.slane %v1530_v51, 1  ;;  %v2663_v25 = vrot.slane %v2385_v36, 1  ;;  %v1532_v46 = vpop.f32.mrb[102].mxu1  ;;  %v2387_v53 = vpop.f32.mrb[102].mxu0 }
 0x1c9   : > { %v1534_v58 = vpop.f32.mrb[103].mxu1  ;;  %v2389_v61 = vpop.f32.mrb[103].mxu0  ;;  %v4532_v63 = vadd.f32 %v1902_v35, %v4372_v17 }
 0x1ca   : > { %v1755_v0 = vsel %vm877_vm0, %v1743_v34, %v1744_v57  ;;  %v2706_v1 = vsel %vm877_vm0, %v2662_v13, %v2663_v25 }
 0x1cb   : > { %v1807_v5 = vadd.f32 %v1755_v0, %v1522_v23  ;;  %v4538_v7 = vadd.f32 %v2706_v1, %v2377_v2 }
 0x1cd   : > { %v1903_v56 = vadd.f32 %v4461_v44, %v1807_v5 }
 0x1ce   : > { %v1538_v8 = vpop.f32.mrb[104].mxu1  ;;  %v2393_v14 = vpop.f32.mrb[104].mxu0 }
 0x1cf   : > { %v1540_v10 = vpop.f32.mrb[105].mxu1  ;;  %v2395_v15 = vpop.f32.mrb[105].mxu0  ;;  %v4542_v16 = vadd.f32 %v1903_v56, %v4375_v20 }
 0x1d0   : > { %v1542_v17 = vpop.f32.mrb[106].mxu1  ;;  %v2397_v21 = vpop.f32.mrb[106].mxu0  ;;  %v1746_v9 = vrot.slane %v1540_v10, 1  ;;  %v2665_v3 = vrot.slane %v2395_v15, 1 }
 0x1d1   : > { %v1544_v59 = vpop.f32.mrb[107].mxu1  ;;  %v2399_v26 = vpop.f32.mrb[107].mxu0 }
 0x1d2   : > { %v1747_v12 = vrot.slane %v1544_v59, 1  ;;  %v2666_v23 = vrot.slane %v2399_v26, 1 }
 0x1d4   : > { %v1752_v2 = vsel %vm877_vm0, %v1746_v9, %v1747_v12  ;;  %v2703_v44 = vsel %vm877_vm0, %v2665_v3, %v2666_v23 }
 0x1d5   : > { %v1810_v31 = vadd.f32 %v1752_v2, %v1538_v8  ;;  %v4548_v4 = vadd.f32 %v2703_v44, %v2393_v14 }
 0x1d6   : > { %v1548_v33 = vpop.f32.mrb[108].mxu1  ;;  %v2403_v20 = vpop.f32.mrb[108].mxu0 }
 0x1d7   : > { %v1906_v19 = vadd.f32 %v4478_v43, %v1810_v31  ;;  %v1550_v34 = vpop.f32.mrb[109].mxu1  ;;  %v2405_v13 = vpop.f32.mrb[109].mxu0 }
 0x1d8   : > { %v1748_v38 = vrot.slane %v1550_v34, 1  ;;  %v2667_v45 = vrot.slane %v2405_v13, 1  ;;  %v1552_v42 = vpop.f32.mrb[110].mxu1  ;;  %v2407_v55 = vpop.f32.mrb[110].mxu0 }
 0x1d9   : > { %v1554_v37 = vpop.f32.mrb[111].mxu1  ;;  %v2409_v35 = vpop.f32.mrb[111].mxu0  ;;  %v4553_v51 = vadd.f32 %v1906_v19, %v4388_v24 }
 0x1da   : > { %v1751_v36 = vsel %vm877_vm0, %v1747_v12, %v1748_v38  ;;  %v2702_v57 = vsel %vm877_vm0, %v2666_v23, %v2667_v45  ;;  %v4579_v12 = vld [vmem:[%s4706_s2] ss:$0 sm:$0xff] }
 0x1db   : > { %v1811_v43 = vadd.f32 %v1751_v36, %v1542_v17  ;;  %v4559_v25 = vadd.f32 %v2702_v57, %v2397_v21 }
 0x1dd   : > { %v1907_v46 = vadd.f32 %v4474_v6, %v1811_v43 }
 0x1de   : > { %v2413_v53 = vpop.f32.mrb[112].mxu0  ;;  %v3570_v58 = vpop.f32.mrb[112].mxu1 }
 0x1df   : > { %v2415_v61 = vpop.f32.mrb[113].mxu0  ;;  %v2526_v0 = vpop.f32.mrb[113].mxu1  ;;  %v4563_v24 = vadd.f32 %v1907_v46, %v4391_v39  ;;  %v2751_v56 = vrot.slane %v3570_v58, 2 }
 0x1e0   : > { %v2417_v1 = vpop.f32.mrb[114].mxu0  ;;  %v3571_v5 = vpop.f32.mrb[114].mxu1  ;;  %v2669_v10 = vrot.slane %v2415_v61, 1  ;;  %v2749_v15 = vrot.slane %v2526_v0, 2 }
 0x1e1   : > { %v2419_v8 = vpop.f32.mrb[115].mxu0  ;;  %v2529_v14 = vpop.f32.mrb[115].mxu1 }
 0x1e2   : > { %v2670_v17 = vrot.slane %v2419_v8, 1  ;;  %v2750_v21 = vrot.slane %v2529_v14, 2 }
 0x1e4   : > { %v2699_v6 = vsel %vm877_vm0, %v2669_v10, %v2670_v17  ;;  %v2810_v59 = vsel %vm974_vm1, %v2750_v21, %v2751_v56  ;;  %v2811_v39 = vsel %vm974_vm1, %v2749_v15, %v2750_v21 }
 0x1e5   : > { %v4572_v26 = vadd.f32 %v2699_v6, %v2413_v53  ;;  %v2813_v9 = vadd.f32 %v2811_v39, %v4488_v47  ;;  %v2814_v3 = vadd.f32 %v2810_v59, %v4498_v29 }
 0x1e6   : > { %v2423_v23 = vpop.f32.mrb[116].mxu0  ;;  %v3574_v2 = vpop.f32.mrb[116].mxu1 }
 0x1e7   : > { %v2877_v44 = vadd.f32 %v2813_v9, %v4400_v48  ;;  %v2878_v31 = vadd.f32 %v2814_v3, %v4409_v18  ;;  %v2425_v33 = vpop.f32.mrb[117].mxu0  ;;  %v2542_v20 = vpop.f32.mrb[117].mxu1  ;;  %v2755_v48 = vrot.slane %v3574_v2, 2 }
 0x1e8   : > { %v2671_v19 = vrot.slane %v2425_v33, 1  ;;  %v2427_v34 = vpop.f32.mrb[118].mxu0  ;;  %v3575_v13 = vpop.f32.mrb[118].mxu1  ;;  %v2753_v42 = vrot.slane %v2542_v20, 2 }
 0x1e9   : > { %v2964_v47 = vadd.f32 %v4579_v12, %v2877_v44  ;;  %v2965_v29 = vadd.f32 %v4579_v12, %v2878_v31  ;;  %v2429_v38 = vpop.f32.mrb[119].mxu0  ;;  %v2545_v45 = vpop.f32.mrb[119].mxu1 }
 0x1ea   : > { %v2698_v18 = vsel %vm877_vm0, %v2670_v17, %v2671_v19  ;;  %v2754_v55 = vrot.slane %v2545_v45, 2 }
 0x1eb   : > { %v2980_v37 = vmax.f32 %v2964_v47, 0.0  ;;  %v2981_v35 = vmax.f32 %v2965_v29, 0.0  ;;  %v4592_v36 = vadd.f32 %v2698_v18, %v2417_v1 }
 0x1ec   : > { %v2806_v57 = vsel %vm974_vm1, %v2754_v55, %v2755_v48  ;;  %v2807_v43 = vsel %vm974_vm1, %v2753_v42, %v2754_v55 }
 0x1ed   : > { %2996 = vst [vmem:[%s4588_s22] sm:$0xff] %v2980_v37  ;;  %2997 = vst [vmem:[%s4588_s22 + $0x8] sm:$0xff] %v2981_v35  ;;  %v2817_v46 = vadd.f32 %v2807_v43, %v4508_v54  ;;  %v2818_v53 = vadd.f32 %v2806_v57, %v4518_v22 }
 0x1ee   : > { %v2433_v58 = vpop.f32.mrb[120].mxu0  ;;  %v3578_v61 = vpop.f32.mrb[120].mxu1 }
 0x1ef   : > { %v2881_v0 = vadd.f32 %v2817_v46, %v4418_v60  ;;  %v2882_v5 = vadd.f32 %v2818_v53, %v4429_v11  ;;  %v2435_v1 = vpop.f32.mrb[121].mxu0  ;;  %v2558_v56 = vpop.f32.mrb[121].mxu1  ;;  %v2759_v17 = vrot.slane %v3578_v61, 2 }
 0x1f0   : > { %v2437_v8 = vpop.f32.mrb[122].mxu0  ;;  %v3579_v14 = vpop.f32.mrb[122].mxu1  ;;  %v2673_v22 = vrot.slane %v2435_v1, 1  ;;  %v2757_v6 = vrot.slane %v2558_v56, 2 }
 0x1f1   : > { %v2966_v10 = vadd.f32 %v4579_v12, %v2881_v0  ;;  %v2967_v15 = vadd.f32 %v4579_v12, %v2882_v5  ;;  %v2439_v54 = vpop.f32.mrb[123].mxu0  ;;  %v2561_v21 = vpop.f32.mrb[123].mxu1 }
 0x1f2   : > { %v2674_v59 = vrot.slane %v2439_v54, 1  ;;  %v2758_v39 = vrot.slane %v2561_v21, 2 }
 0x1f3   : > { %v2982_v60 = vmax.f32 %v2966_v10, 0.0  ;;  %v2983_v9 = vmax.f32 %v2967_v15, 0.0 }
 0x1f4   : > { %v2695_v11 = vsel %vm877_vm0, %v2673_v22, %v2674_v59  ;;  %v2802_v3 = vsel %vm974_vm1, %v2758_v39, %v2759_v17  ;;  %v2803_v23 = vsel %vm974_vm1, %v2757_v6, %v2758_v39 }
 0x1f5   : > { %2998 = vst [vmem:[%s4588_s22 + $0x10] sm:$0xff] %v2982_v60  ;;  %2999 = vst [vmem:[%s4588_s22 + $0x18] sm:$0xff] %v2983_v9  ;;  %v4614_v2 = vadd.f32 %v2695_v11, %v2433_v58  ;;  %v2821_v44 = vadd.f32 %v2803_v23, %v4528_v41  ;;  %v2822_v31 = vadd.f32 %v2802_v3, %v4538_v7 }
 0x1f6   : > { %v2443_v33 = vpop.f32.mrb[124].mxu0  ;;  %v3582_v20 = vpop.f32.mrb[124].mxu1 }
 0x1f7   : > { %v2885_v19 = vadd.f32 %v2821_v44, %v4442_v49  ;;  %v2886_v34 = vadd.f32 %v2822_v31, %v4455_v62  ;;  %v2445_v13 = vpop.f32.mrb[125].mxu0  ;;  %v2574_v47 = vpop.f32.mrb[125].mxu1  ;;  %v2763_v7 = vrot.slane %v3582_v20, 2 }
 0x1f8   : > { %v2675_v29 = vrot.slane %v2445_v13, 1  ;;  %v2447_v38 = vpop.f32.mrb[126].mxu0  ;;  %v3583_v45 = vpop.f32.mrb[126].mxu1  ;;  %v2761_v49 = vrot.slane %v2574_v47, 2 }
 0x1f9   : > { %v2968_v48 = vadd.f32 %v4579_v12, %v2885_v19  ;;  %v2969_v18 = vadd.f32 %v4579_v12, %v2886_v34  ;;  %v2449_v41 = vpop.f32.mrb[127].mxu0  ;;  %v2577_v42 = vpop.f32.mrb[127].mxu1 }
 0x1fa   : > { %v2694_v55 = vsel %vm877_vm0, %v2674_v59, %v2675_v29  ;;  %v2762_v37 = vrot.slane %v2577_v42, 2 }
 0x1fb   : > { %v2984_v62 = vmax.f32 %v2968_v48, 0.0  ;;  %v2985_v35 = vmax.f32 %v2969_v18, 0.0  ;;  %v2738_v57 = vadd.f32 %v2694_v55, %v2437_v8 }
 0x1fc   : > { %v2798_v43 = vsel %vm974_vm1, %v2762_v37, %v2763_v7  ;;  %v2799_v46 = vsel %vm974_vm1, %v2761_v49, %v2762_v37 }
 0x1fd   : > { %3000 = vst [vmem:[%s4588_s22 + $0x20] sm:$0xff] %v2984_v62  ;;  %3001 = vst [vmem:[%s4588_s22 + $0x28] sm:$0xff] %v2985_v35  ;;  %v2825_v53 = vadd.f32 %v2799_v46, %v4548_v4  ;;  %v2826_v58 = vadd.f32 %v2798_v43, %v4559_v25 }
 0x1fe   : > { %v2453_v61 = vpop.f32.mrb[128].mxu0  ;;  %v3586_v0 = vpop.f32.mrb[128].mxu1 }
 0x1ff   : > { %v2889_v5 = vadd.f32 %v2825_v53, %v4468_v32  ;;  %v2890_v1 = vadd.f32 %v2826_v58, %v4482_v52  ;;  %v2455_v56 = vpop.f32.mrb[129].mxu0  ;;  %v2590_v8 = vpop.f32.mrb[129].mxu1  ;;  %v2767_v54 = vrot.slane %v3586_v0, 2 }
 0x200   : > { %v2457_v14 = vpop.f32.mrb[130].mxu0  ;;  %v3587_v10 = vpop.f32.mrb[130].mxu1  ;;  %v2677_v25 = vrot.slane %v2455_v56, 1  ;;  %v2765_v22 = vrot.slane %v2590_v8, 2 }
 0x201   : > { %v2970_v15 = vadd.f32 %v4579_v12, %v2889_v5  ;;  %v2971_v17 = vadd.f32 %v4579_v12, %v2890_v1  ;;  %v2459_v4 = vpop.f32.mrb[131].mxu0  ;;  %v2593_v21 = vpop.f32.mrb[131].mxu1 }
 0x202   : > { %v2678_v6 = vrot.slane %v2459_v4, 1  ;;  %v2766_v59 = vrot.slane %v2593_v21, 2 }
 0x203   : > { %v2986_v32 = vmax.f32 %v2970_v15, 0.0  ;;  %v2987_v39 = vmax.f32 %v2971_v17, 0.0 }
 0x204   : > { %v2691_v52 = vsel %vm877_vm0, %v2677_v25, %v2678_v6  ;;  %v2794_v60 = vsel %vm974_vm1, %v2766_v59, %v2767_v54  ;;  %v2795_v9 = vsel %vm974_vm1, %v2765_v22, %v2766_v59 }
 0x205   : > { %3002 = vst [vmem:[%s4588_s22 + $0x30] sm:$0xff] %v2986_v32  ;;  %3003 = vst [vmem:[%s4588_s22 + $0x38] sm:$0xff] %v2987_v39  ;;  %v2741_v11 = vadd.f32 %v2691_v52, %v2453_v61  ;;  %v2829_v3 = vadd.f32 %v2795_v9, %v4572_v26  ;;  %v2830_v23 = vadd.f32 %v2794_v60, %v4592_v36 }
 0x206   : > { %v2463_v44 = vpop.f32.mrb[132].mxu0  ;;  %v3590_v31 = vpop.f32.mrb[132].mxu1 }
 0x207   : > { %v2893_v33 = vadd.f32 %v2829_v3, %v4492_v27  ;;  %v2894_v20 = vadd.f32 %v2830_v23, %v4502_v40  ;;  %v2465_v19 = vpop.f32.mrb[133].mxu0  ;;  %v2606_v34 = vpop.f32.mrb[133].mxu1  ;;  %v2771_v36 = vrot.slane %v3590_v31, 2 }
 0x208   : > { %v2679_v13 = vrot.slane %v2465_v19, 1  ;;  %v2467_v47 = vpop.f32.mrb[134].mxu0  ;;  %v3591_v29 = vpop.f32.mrb[134].mxu1  ;;  %v2769_v27 = vrot.slane %v2606_v34, 2 }
 0x209   : > { %v2972_v38 = vadd.f32 %v4579_v12, %v2893_v33  ;;  %v2973_v45 = vadd.f32 %v4579_v12, %v2894_v20  ;;  %v2469_v26 = vpop.f32.mrb[135].mxu0  ;;  %v2609_v48 = vpop.f32.mrb[135].mxu1 }
 0x20a   : > { %v2690_v18 = vsel %vm877_vm0, %v2678_v6, %v2679_v13  ;;  %v2770_v41 = vrot.slane %v2609_v48, 2 }
 0x20b   : > { %v2988_v40 = vmax.f32 %v2972_v38, 0.0  ;;  %v2989_v42 = vmax.f32 %v2973_v45, 0.0  ;;  %v2742_v7 = vadd.f32 %v2690_v18, %v2457_v14 }
 0x20c   : > { %v2790_v55 = vsel %vm974_vm1, %v2770_v41, %v2771_v36  ;;  %v2791_v49 = vsel %vm974_vm1, %v2769_v27, %v2770_v41 }
 0x20d   : > { %3004 = vst [vmem:[%s4588_s22 + $0x40] sm:$0xff] %v2988_v40  ;;  %3005 = vst [vmem:[%s4588_s22 + $0x48] sm:$0xff] %v2989_v42  ;;  %v2833_v37 = vadd.f32 %v2791_v49, %v4614_v2  ;;  %v2834_v62 = vadd.f32 %v2790_v55, %v2738_v57 }
 0x20e   : > { %v2473_v35 = vpop.f32.mrb[136].mxu0  ;;  %v3594_v43 = vpop.f32.mrb[136].mxu1 }
 0x20f   : > { %v2897_v46 = vadd.f32 %v2833_v37, %v4512_v30  ;;  %v2898_v53 = vadd.f32 %v2834_v62, %v4522_v28  ;;  %v2475_v58 = vpop.f32.mrb[137].mxu0  ;;  %v2622_v61 = vpop.f32.mrb[137].mxu1  ;;  %v2775_v8 = vrot.slane %v3594_v43, 2 }
 0x210   : > { %v2477_v0 = vpop.f32.mrb[138].mxu0  ;;  %v3595_v5 = vpop.f32.mrb[138].mxu1  ;;  %v2681_v57 = vrot.slane %v2475_v58, 1  ;;  %v2773_v10 = vrot.slane %v2622_v61, 2 }
 0x211   : > { %v2974_v1 = vadd.f32 %v4579_v12, %v2897_v46  ;;  %v2975_v56 = vadd.f32 %v4579_v12, %v2898_v53  ;;  %v2479_v14 = vpop.f32.mrb[139].mxu0  ;;  %v2625_v2 = vpop.f32.mrb[139].mxu1 }
 0x212   : > { %v2682_v15 = vrot.slane %v2479_v14, 1  ;;  %v2774_v17 = vrot.slane %v2625_v2, 2 }
 0x213   : > { %v2990_v30 = vmax.f32 %v2974_v1, 0.0  ;;  %v2991_v54 = vmax.f32 %v2975_v56, 0.0 }
 0x214   : > { %v2687_v28 = vsel %vm877_vm0, %v2681_v57, %v2682_v15  ;;  %v2786_v4 = vsel %vm974_vm1, %v2774_v17, %v2775_v8  ;;  %v2787_v21 = vsel %vm974_vm1, %v2773_v10, %v2774_v17 }
 0x215   : > { %3006 = vst [vmem:[%s4588_s22 + $0x50] sm:$0xff] %v2990_v30  ;;  %3007 = vst [vmem:[%s4588_s22 + $0x58] sm:$0xff] %v2991_v54  ;;  %v2745_v25 = vadd.f32 %v2687_v28, %v2473_v35  ;;  %v2837_v22 = vadd.f32 %v2787_v21, %v2741_v11  ;;  %v2838_v6 = vadd.f32 %v2786_v4, %v2742_v7 }
 0x216   : > { %v2483_v59 = vpop.f32.mrb[140].mxu0  ;;  %v3598_v32 = vpop.f32.mrb[140].mxu1 }
 0x217   : > { %v2901_v39 = vadd.f32 %v2837_v22, %v4532_v63  ;;  %v2902_v52 = vadd.f32 %v2838_v6, %v4542_v16  ;;  %v2485_v60 = vpop.f32.mrb[141].mxu0  ;;  %v2638_v9 = vpop.f32.mrb[141].mxu1  ;;  %v2779_v19 = vrot.slane %v3598_v32, 2 }
 0x218   : > { %v2683_v3 = vrot.slane %v2485_v60, 1  ;;  %v2487_v23 = vpop.f32.mrb[142].mxu0  ;;  %v3599_v44 = vpop.f32.mrb[142].mxu1  ;;  %v2777_v63 = vrot.slane %v2638_v9, 2 }
 0x219   : > { %v2976_v31 = vadd.f32 %v4579_v12, %v2901_v39  ;;  %v2977_v33 = vadd.f32 %v4579_v12, %v2902_v52  ;;  %v2489_v20 = vpop.f32.mrb[143].mxu0  ;;  %v2641_v11 = vpop.f32.mrb[143].mxu1 }
 0x21a   : > { %v2686_v34 = vsel %vm877_vm0, %v2682_v15, %v2683_v3  ;;  %v2778_v13 = vrot.slane %v2641_v11, 2 }
 0x21b   : > { %v2992_v16 = vmax.f32 %v2976_v31, 0.0  ;;  %v2993_v47 = vmax.f32 %v2977_v33, 0.0  ;;  %v2746_v29 = vadd.f32 %v2686_v34, %v2477_v0 }
 0x21c   : > { %v2782_v38 = vsel %vm974_vm1, %v2778_v13, %v2779_v19  ;;  %v2783_v45 = vsel %vm974_vm1, %v2777_v63, %v2778_v13 }
 0x21d   : > { %3008 = vst [vmem:[%s4588_s22 + $0x60] sm:$0xff] %v2992_v16  ;;  %3009 = vst [vmem:[%s4588_s22 + $0x68] sm:$0xff] %v2993_v47  ;;  %v2841_v26 = vadd.f32 %v2783_v45, %v2745_v25  ;;  %v2842_v48 = vadd.f32 %v2782_v38, %v2746_v29 }
 0x21f   : > { %v2905_v36 = vadd.f32 %v2841_v26, %v4553_v51  ;;  %v2906_v18 = vadd.f32 %v2842_v48, %v4563_v24 }
 0x221   : > { %v2978_v27 = vadd.f32 %v4579_v12, %v2905_v36  ;;  %v2979_v41 = vadd.f32 %v4579_v12, %v2906_v18 }
 0x223   : > { %v2994_v40 = vmax.f32 %v2978_v27, 0.0  ;;  %v2995_v42 = vmax.f32 %v2979_v41, 0.0 }
 0x225   : > { %3010 = vst [vmem:[%s4588_s22 + $0x70] sm:$0xff] %v2994_v40  ;;  %3011 = vst [vmem:[%s4588_s22 + $0x78] sm:$0xff] %v2995_v42 }
 0x226 PF: > { %s13_s16 = sadd.s32 1, %s3840_s16   ;;  %s4708_s12 = smov %s3832_s14 }
 0x227   : > { %p10_p7 = scmp.ge.s32.totalorder %s13_s16, 6   ;;  %s4709_s13 = smov %s3836_s15 }
 0x228   : > { %s4710_s14 = smov %s4713_s17  ;;  %s4711_s15 = smov %s4717_s18 }
 0x229   :  { %12 = sbr.rel (!%p10_p7) target bundleno = 3 (0x3), region = 67 }

</bundles_post_ra>
